<compile_context>
chip_gen: v6e
topology: v6e:2x2x1
jax: 0.10.0
libtpu: 0.0.40
codegen_flags: <defaults>
</compile_context>

<pallas_src>
import functools

import jax
import jax.numpy as jnp
import numpy as np
from jax import lax
from jax.experimental import pallas as pl
from jax.experimental.pallas import tpu as pltpu  # noqa: F401  (TPU backend assumed)

NEG_INF = float("-inf")


def _ista2_kernel(q_ref, k_ref, v_ref, o_ref, *, num_heads, qk_scale, v_scale,
                  topk):
  """Single program over the whole (B, P, H*D) slab."""
  B, P, DIM = q_ref.shape
  D = DIM // num_heads

  q_all = q_ref[...]
  k_all = k_ref[...]
  v_all = v_ref[...]

  # "A sample never references its own mean token": mask column n == sample b.
  samp = lax.broadcasted_iota(jnp.int32, (B, P, B), 0)
  refc = lax.broadcasted_iota(jnp.int32, (B, P, B), 2)
  self_mask = samp == refc

  outs = []
  for h in range(num_heads):  # static unroll over heads (4); each step batched over B
    qh = q_all[:, :, h * D:(h + 1) * D]  # (B, P, D)
    kh = k_all[:, :, h * D:(h + 1) * D]  # (B, P, D)
    vh = v_all[:, :, h * D:(h + 1) * D]  # (B, P, D)
    if qk_scale != 1.0:
      qh = qh * qk_scale  # fold scale into the (B,P,D) operand, not (B,P,P) logits

    # ---- standard self-attention logits, batched over samples ----
    attn_self = jnp.einsum("bid,bjd->bij", qh, kh,
                           preferred_element_type=jnp.float32)  # (B, P, P)

    # ---- ISTA2 'v' branch: align v against other samples' mean tokens ----
    v_mean = jnp.mean(vh, axis=1)                               # (B, D)
    attn_tkn = jnp.sum(vh * vh, axis=-1, keepdims=True)         # (B, P, 1)
    attn_inter = lax.dot_general(
        vh.reshape(B * P, D), v_mean, (((1,), (1,)), ((), ())),
        preferred_element_type=jnp.float32).reshape(B, P, B)    # (B, P, B)
    if v_scale != 1.0:
      attn_tkn = attn_tkn * v_scale
      attn_inter = attn_inter * v_scale
    # Masking the self column to -inf is equivalent to PyTorch's explicit
    # (n-1)-column exclusion (zero softmax weight * own mean token == dropped).
    attn_inter = jnp.where(self_mask, NEG_INF, attn_inter)

    # top-k along the reference axis (iterative max == torch.topk threshold for
    # distinct values; ties at the threshold may keep extra entries).
    work = attn_inter
    kth = None
    for _ in range(topk):
      kth = jnp.max(work, axis=-1, keepdims=True)
      work = jnp.where(work >= kth, NEG_INF, work)
    attn_inter = jnp.where(attn_inter >= kth, attn_inter, NEG_INF)

    # joint softmax over [attn_tkn | attn_inter]  (concat done implicitly)
    row_max = jnp.maximum(attn_tkn, jnp.max(attn_inter, axis=-1, keepdims=True))
    e_tkn = jnp.exp(attn_tkn - row_max)                          # (B, P, 1)
    e_inter = jnp.exp(attn_inter - row_max)                      # (B, P, B); -inf -> 0
    inv = pl.reciprocal(e_tkn + jnp.sum(e_inter, axis=-1, keepdims=True),
                        approx=False)                            # (B, P, 1)
    cross = jnp.dot((e_inter * inv).reshape(B * P, B), v_mean,
                    preferred_element_type=jnp.float32).reshape(B, P, D)
    v_new = (e_tkn * inv) * vh + cross                           # (B, P, D)

    # ---- softmax(self-attn) @ aligned v ----
    s = jnp.exp(attn_self - jnp.max(attn_self, axis=-1, keepdims=True))
    probs = s * pl.reciprocal(jnp.sum(s, axis=-1, keepdims=True), approx=False)
    outs.append(jnp.einsum("bij,bjd->bid", probs, v_new,
                           preferred_element_type=jnp.float32))  # (B, P, D)

  # One full-tile store of the assembled (B, P, H*D) result.
  o_ref[...] = jnp.concatenate(outs, axis=-1).astype(o_ref.dtype)


def ista2_forward(q, k, v, *, num_heads=4, qk_scale=1.0, v_scale=1.0,
                  attn_inter_topk=2):
  """q, k, v: (b, p, h*d) float32. Returns (b, p, h*d)."""
  b, p1, dim = q.shape
  _, p2, _ = k.shape
  assert p1 == p2 and dim % num_heads == 0
  assert b > 1 and 1 <= attn_inter_topk <= b - 1  # multi_samples & valid top-k

  kernel = functools.partial(_ista2_kernel, num_heads=num_heads,
                             qk_scale=qk_scale, v_scale=v_scale,
                             topk=attn_inter_topk)
  # No grid: the whole arrays (total footprint ~16 KiB) are mapped into VMEM and
  # processed by a single program; inputs/output keep their native layout.
  return pl.pallas_call(
      kernel,
      out_shape=jax.ShapeDtypeStruct((b, p1, dim), jnp.float32),
  )(q, k, v)


def ista2_reference(q, k, v, *, num_heads=4, qk_scale=1.0, v_scale=1.0,
                    attn_inter_topk=2):
  """Pure-JAX mirror of the PyTorch forward (ista2_method='v', rep='mean')."""
  b, p, dim = q.shape
  d = dim // num_heads
  qh = q.reshape(b, p, num_heads, d).transpose(2, 0, 1, 3)
  kh = k.reshape(b, p, num_heads, d).transpose(2, 0, 1, 3)
  vh = v.reshape(b, p, num_heads, d).transpose(2, 0, 1, 3)

  attn_self = jnp.einsum("hbik,hbjk->hbij", qh, kh) * qk_scale

  v_mean = vh.mean(axis=2)  # (h, b, d)
  refs = []
  for m in range(b):
    idxs = [n for n in range(b) if n != m]
    refs.append(v_mean[:, idxs, :])
  v_refs = jnp.stack(refs, axis=1)  # (h, b, b-1, d)

  attn_tkn = jnp.sum(vh * vh, axis=-1, keepdims=True) * v_scale
  attn_inter = jnp.einsum("hbpd,hbnd->hbpn", vh, v_refs) * v_scale
  vals, _ = lax.top_k(attn_inter, attn_inter_topk)
  thresh = vals[..., -1:]
  attn_inter = jnp.where(attn_inter >= thresh, attn_inter, -jnp.inf)
  attn = jnp.concatenate([attn_tkn, attn_inter], axis=-1)
  attn = jax.nn.softmax(attn, axis=-1)
  v_new = attn[..., :1] * vh + jnp.einsum("hbpn,hbnd->hbpd", attn[..., 1:], v_refs)

  probs = jax.nn.softmax(attn_self, axis=-1)
  x = jnp.einsum("hbij,hbjd->hbid", probs, v_new)
  return x.transpose(1, 2, 0, 3).reshape(b, p, dim)


if __name__ == "__main__":
  # TODO(synk): across_gpus / concat_all_gather (distributed all-gather) has no
  # single-device Pallas equivalent; single-device semantics are implemented.
  B, P, DIM, H = 4, 8, 32, 4
  key = jax.random.PRNGKey(0)
  kq, kk, kv = jax.random.split(key, 3)
  q = jax.random.normal(kq, (B, P, DIM), dtype=jnp.float32)
  k = jax.random.normal(kk, (B, P, DIM), dtype=jnp.float32)
  v = jax.random.normal(kv, (B, P, DIM), dtype=jnp.float32)

  out = ista2_forward(q, k, v, num_heads=H)
  jax.block_until_ready(out)

  ref = ista2_reference(q, k, v, num_heads=H)
  np.testing.assert_allclose(np.asarray(out), np.asarray(ref), rtol=2e-5, atol=2e-5)
  print("KERNEL_OK")
</pallas_src>

<mosaic_0001>
module attributes {stable_mosaic.version = 11 : i64} {
  func.func @_ista2_kernel(%arg0: memref<4x8x32xf32, #tpu.memory_space<vmem>>, %arg1: memref<4x8x32xf32, #tpu.memory_space<vmem>>, %arg2: memref<4x8x32xf32, #tpu.memory_space<vmem>>, %arg3: memref<4x8x32xf32, #tpu.memory_space<vmem>>) attributes {dimension_semantics = [], scalar_prefetch = 0 : i64, scratch_operands = 0 : i64, tpu.core_type = #tpu.core_type<tc>} {
    %c0 = arith.constant 0 : index
    %c0_0 = arith.constant 0 : index
    %c0_1 = arith.constant 0 : index
    %0 = vector.load %arg0[%c0, %c0_0, %c0_1] : memref<4x8x32xf32, #tpu.memory_space<vmem>>, vector<4x8x32xf32>
    %c0_2 = arith.constant 0 : index
    %c0_3 = arith.constant 0 : index
    %c0_4 = arith.constant 0 : index
    %1 = vector.load %arg1[%c0_2, %c0_3, %c0_4] : memref<4x8x32xf32, #tpu.memory_space<vmem>>, vector<4x8x32xf32>
    %c0_5 = arith.constant 0 : index
    %c0_6 = arith.constant 0 : index
    %c0_7 = arith.constant 0 : index
    %2 = vector.load %arg2[%c0_5, %c0_6, %c0_7] : memref<4x8x32xf32, #tpu.memory_space<vmem>>, vector<4x8x32xf32>
    %3 = tpu.iota {dimensions = array<i32: 0>} : vector<4x8x4xi32>
    %4 = tpu.iota {dimensions = array<i32: 2>} : vector<4x8x4xi32>
    %5 = arith.cmpi eq, %3, %4 : vector<4x8x4xi32>
    %6 = vector.extract_strided_slice %0 {offsets = [0, 0, 0], sizes = [4, 8, 8], strides = [1, 1, 1]} : vector<4x8x32xf32> to vector<4x8x8xf32>
    %7 = vector.extract_strided_slice %1 {offsets = [0, 0, 0], sizes = [4, 8, 8], strides = [1, 1, 1]} : vector<4x8x32xf32> to vector<4x8x8xf32>
    %8 = vector.extract_strided_slice %2 {offsets = [0, 0, 0], sizes = [4, 8, 8], strides = [1, 1, 1]} : vector<4x8x32xf32> to vector<4x8x8xf32>
    "tpu.trace_start"() <{level = 10 : i32, message = "bid,bjd->bij"}> : () -> ()
    %cst = arith.constant dense<0.000000e+00> : vector<4x8x8xf32>
    %9 = tpu.matmul %6, %7, %cst {dimension_numbers = #tpu.dot_dimension_numbers<[2], [2], [1], [1], [0, 0, 0, 1, 1, 1], [0], [0]>} : vector<4x8x8xf32>, vector<4x8x8xf32>, vector<4x8x8xf32> -> vector<4x8x8xf32>
    "tpu.trace_stop"() : () -> ()
    %cst_8 = arith.constant dense<0.000000e+00> : vector<4x8xf32>
    %10 = vector.multi_reduction <add>, %8, %cst_8 [1] : vector<4x8x8xf32> to vector<4x8xf32>
    %cst_9 = arith.constant 8.000000e+00 : f32
    %11 = vector.broadcast %cst_9 : f32 to vector<4x8xf32>
    %12 = arith.divf %10, %11 : vector<4x8xf32>
    %13 = arith.mulf %8, %8 : vector<4x8x8xf32>
    %cst_10 = arith.constant dense<0.000000e+00> : vector<4x8xf32>
    %14 = vector.multi_reduction <add>, %13, %cst_10 [2] : vector<4x8x8xf32> to vector<4x8xf32>
    %15 = vector.shape_cast %14 : vector<4x8xf32> to vector<4x8x1xf32>
    %16 = vector.shape_cast %8 : vector<4x8x8xf32> to vector<32x8xf32>
    %cst_11 = arith.constant dense<0.000000e+00> : vector<32x4xf32>
    %17 = tpu.matmul %16, %12, %cst_11 {dimension_numbers = #tpu.dot_dimension_numbers<[1], [1], [0], [0], [0, 0, 1, 0], [], []>} : vector<32x8xf32>, vector<4x8xf32>, vector<32x4xf32> -> vector<32x4xf32>
    %18 = vector.shape_cast %17 : vector<32x4xf32> to vector<4x8x4xf32>
    %cst_12 = arith.constant 0xFF800000 : f32
    %19 = vector.broadcast %cst_12 : f32 to vector<4x8x4xf32>
    %20 = arith.select %5, %19, %18 : vector<4x8x4xi1>, vector<4x8x4xf32>
    %cst_13 = arith.constant dense<0xFF800000> : vector<4x8xf32>
    %21 = vector.multi_reduction <maximumf>, %20, %cst_13 [2] : vector<4x8x4xf32> to vector<4x8xf32>
    %22 = vector.shape_cast %21 : vector<4x8xf32> to vector<4x8x1xf32>
    %23 = vector.broadcast %22 : vector<4x8x1xf32> to vector<4x8x4xf32>
    %24 = arith.cmpf oge, %20, %23 : vector<4x8x4xf32>
    %cst_14 = arith.constant 0xFF800000 : f32
    %25 = vector.broadcast %cst_14 : f32 to vector<4x8x4xf32>
    %26 = arith.select %24, %25, %20 : vector<4x8x4xi1>, vector<4x8x4xf32>
    %cst_15 = arith.constant dense<0xFF800000> : vector<4x8xf32>
    %27 = vector.multi_reduction <maximumf>, %26, %cst_15 [2] : vector<4x8x4xf32> to vector<4x8xf32>
    %28 = vector.shape_cast %27 : vector<4x8xf32> to vector<4x8x1xf32>
    %29 = vector.broadcast %28 : vector<4x8x1xf32> to vector<4x8x4xf32>
    %30 = arith.cmpf oge, %20, %29 : vector<4x8x4xf32>
    %cst_16 = arith.constant 0xFF800000 : f32
    %31 = vector.broadcast %cst_16 : f32 to vector<4x8x4xf32>
    %32 = arith.select %30, %20, %31 : vector<4x8x4xi1>, vector<4x8x4xf32>
    %cst_17 = arith.constant dense<0xFF800000> : vector<4x8xf32>
    %33 = vector.multi_reduction <maximumf>, %32, %cst_17 [2] : vector<4x8x4xf32> to vector<4x8xf32>
    %34 = vector.shape_cast %33 : vector<4x8xf32> to vector<4x8x1xf32>
    %35 = arith.maximumf %15, %34 : vector<4x8x1xf32>
    %36 = arith.subf %15, %35 : vector<4x8x1xf32>
    %37 = math.exp %36 : vector<4x8x1xf32>
    %38 = vector.broadcast %35 : vector<4x8x1xf32> to vector<4x8x4xf32>
    %39 = arith.subf %32, %38 : vector<4x8x4xf32>
    %40 = math.exp %39 : vector<4x8x4xf32>
    %cst_18 = arith.constant dense<0.000000e+00> : vector<4x8xf32>
    %41 = vector.multi_reduction <add>, %40, %cst_18 [2] : vector<4x8x4xf32> to vector<4x8xf32>
    %42 = vector.shape_cast %41 : vector<4x8xf32> to vector<4x8x1xf32>
    %43 = arith.addf %37, %42 : vector<4x8x1xf32>
    %44 = tpu.reciprocal %43 : vector<4x8x1xf32> -> vector<4x8x1xf32>
    %45 = vector.broadcast %44 : vector<4x8x1xf32> to vector<4x8x4xf32>
    %46 = arith.mulf %40, %45 : vector<4x8x4xf32>
    %47 = vector.shape_cast %46 : vector<4x8x4xf32> to vector<32x4xf32>
    %cst_19 = arith.constant dense<0.000000e+00> : vector<32x8xf32>
    %48 = tpu.matmul %47, %12, %cst_19 {dimension_numbers = #tpu.dot_dimension_numbers<[1], [0], [0], [1], [0, 0, 1, 1], [], []>} : vector<32x4xf32>, vector<4x8xf32>, vector<32x8xf32> -> vector<32x8xf32>
    %49 = vector.shape_cast %48 : vector<32x8xf32> to vector<4x8x8xf32>
    %50 = arith.mulf %37, %44 : vector<4x8x1xf32>
    %51 = vector.broadcast %50 : vector<4x8x1xf32> to vector<4x8x8xf32>
    %52 = arith.mulf %51, %8 : vector<4x8x8xf32>
    %53 = arith.addf %52, %49 : vector<4x8x8xf32>
    %cst_20 = arith.constant dense<0xFF800000> : vector<4x8xf32>
    %54 = vector.multi_reduction <maximumf>, %9, %cst_20 [2] : vector<4x8x8xf32> to vector<4x8xf32>
    %55 = vector.shape_cast %54 : vector<4x8xf32> to vector<4x8x1xf32>
    %56 = vector.broadcast %55 : vector<4x8x1xf32> to vector<4x8x8xf32>
    %57 = arith.subf %9, %56 : vector<4x8x8xf32>
    %58 = math.exp %57 : vector<4x8x8xf32>
    %cst_21 = arith.constant dense<0.000000e+00> : vector<4x8xf32>
    %59 = vector.multi_reduction <add>, %58, %cst_21 [2] : vector<4x8x8xf32> to vector<4x8xf32>
    %60 = vector.shape_cast %59 : vector<4x8xf32> to vector<4x8x1xf32>
    %61 = tpu.reciprocal %60 : vector<4x8x1xf32> -> vector<4x8x1xf32>
    %62 = vector.broadcast %61 : vector<4x8x1xf32> to vector<4x8x8xf32>
    %63 = arith.mulf %58, %62 : vector<4x8x8xf32>
    "tpu.trace_start"() <{level = 10 : i32, message = "bij,bjd->bid"}> : () -> ()
    %cst_22 = arith.constant dense<0.000000e+00> : vector<4x8x8xf32>
    %64 = tpu.matmul %63, %53, %cst_22 {dimension_numbers = #tpu.dot_dimension_numbers<[2], [1], [1], [2], [0, 0, 0, 1, 1, 2], [0], [0]>} : vector<4x8x8xf32>, vector<4x8x8xf32>, vector<4x8x8xf32> -> vector<4x8x8xf32>
    "tpu.trace_stop"() : () -> ()
    %65 = vector.extract_strided_slice %0 {offsets = [0, 0, 8], sizes = [4, 8, 8], strides = [1, 1, 1]} : vector<4x8x32xf32> to vector<4x8x8xf32>
    %66 = vector.extract_strided_slice %1 {offsets = [0, 0, 8], sizes = [4, 8, 8], strides = [1, 1, 1]} : vector<4x8x32xf32> to vector<4x8x8xf32>
    %67 = vector.extract_strided_slice %2 {offsets = [0, 0, 8], sizes = [4, 8, 8], strides = [1, 1, 1]} : vector<4x8x32xf32> to vector<4x8x8xf32>
    "tpu.trace_start"() <{level = 10 : i32, message = "bid,bjd->bij"}> : () -> ()
    %cst_23 = arith.constant dense<0.000000e+00> : vector<4x8x8xf32>
    %68 = tpu.matmul %65, %66, %cst_23 {dimension_numbers = #tpu.dot_dimension_numbers<[2], [2], [1], [1], [0, 0, 0, 1, 1, 1], [0], [0]>} : vector<4x8x8xf32>, vector<4x8x8xf32>, vector<4x8x8xf32> -> vector<4x8x8xf32>
    "tpu.trace_stop"() : () -> ()
    %cst_24 = arith.constant dense<0.000000e+00> : vector<4x8xf32>
    %69 = vector.multi_reduction <add>, %67, %cst_24 [1] : vector<4x8x8xf32> to vector<4x8xf32>
    %cst_25 = arith.constant 8.000000e+00 : f32
    %70 = vector.broadcast %cst_25 : f32 to vector<4x8xf32>
    %71 = arith.divf %69, %70 : vector<4x8xf32>
    %72 = arith.mulf %67, %67 : vector<4x8x8xf32>
    %cst_26 = arith.constant dense<0.000000e+00> : vector<4x8xf32>
    %73 = vector.multi_reduction <add>, %72, %cst_26 [2] : vector<4x8x8xf32> to vector<4x8xf32>
    %74 = vector.shape_cast %73 : vector<4x8xf32> to vector<4x8x1xf32>
    %75 = vector.shape_cast %67 : vector<4x8x8xf32> to vector<32x8xf32>
    %cst_27 = arith.constant dense<0.000000e+00> : vector<32x4xf32>
    %76 = tpu.matmul %75, %71, %cst_27 {dimension_numbers = #tpu.dot_dimension_numbers<[1], [1], [0], [0], [0, 0, 1, 0], [], []>} : vector<32x8xf32>, vector<4x8xf32>, vector<32x4xf32> -> vector<32x4xf32>
    %77 = vector.shape_cast %76 : vector<32x4xf32> to vector<4x8x4xf32>
    %cst_28 = arith.constant 0xFF800000 : f32
    %78 = vector.broadcast %cst_28 : f32 to vector<4x8x4xf32>
    %79 = arith.select %5, %78, %77 : vector<4x8x4xi1>, vector<4x8x4xf32>
    %cst_29 = arith.constant dense<0xFF800000> : vector<4x8xf32>
    %80 = vector.multi_reduction <maximumf>, %79, %cst_29 [2] : vector<4x8x4xf32> to vector<4x8xf32>
    %81 = vector.shape_cast %80 : vector<4x8xf32> to vector<4x8x1xf32>
    %82 = vector.broadcast %81 : vector<4x8x1xf32> to vector<4x8x4xf32>
    %83 = arith.cmpf oge, %79, %82 : vector<4x8x4xf32>
    %cst_30 = arith.constant 0xFF800000 : f32
    %84 = vector.broadcast %cst_30 : f32 to vector<4x8x4xf32>
    %85 = arith.select %83, %84, %79 : vector<4x8x4xi1>, vector<4x8x4xf32>
    %cst_31 = arith.constant dense<0xFF800000> : vector<4x8xf32>
    %86 = vector.multi_reduction <maximumf>, %85, %cst_31 [2] : vector<4x8x4xf32> to vector<4x8xf32>
    %87 = vector.shape_cast %86 : vector<4x8xf32> to vector<4x8x1xf32>
    %88 = vector.broadcast %87 : vector<4x8x1xf32> to vector<4x8x4xf32>
    %89 = arith.cmpf oge, %79, %88 : vector<4x8x4xf32>
    %cst_32 = arith.constant 0xFF800000 : f32
    %90 = vector.broadcast %cst_32 : f32 to vector<4x8x4xf32>
    %91 = arith.select %89, %79, %90 : vector<4x8x4xi1>, vector<4x8x4xf32>
    %cst_33 = arith.constant dense<0xFF800000> : vector<4x8xf32>
    %92 = vector.multi_reduction <maximumf>, %91, %cst_33 [2] : vector<4x8x4xf32> to vector<4x8xf32>
    %93 = vector.shape_cast %92 : vector<4x8xf32> to vector<4x8x1xf32>
    %94 = arith.maximumf %74, %93 : vector<4x8x1xf32>
    %95 = arith.subf %74, %94 : vector<4x8x1xf32>
    %96 = math.exp %95 : vector<4x8x1xf32>
    %97 = vector.broadcast %94 : vector<4x8x1xf32> to vector<4x8x4xf32>
    %98 = arith.subf %91, %97 : vector<4x8x4xf32>
    %99 = math.exp %98 : vector<4x8x4xf32>
    %cst_34 = arith.constant dense<0.000000e+00> : vector<4x8xf32>
    %100 = vector.multi_reduction <add>, %99, %cst_34 [2] : vector<4x8x4xf32> to vector<4x8xf32>
    %101 = vector.shape_cast %100 : vector<4x8xf32> to vector<4x8x1xf32>
    %102 = arith.addf %96, %101 : vector<4x8x1xf32>
    %103 = tpu.reciprocal %102 : vector<4x8x1xf32> -> vector<4x8x1xf32>
    %104 = vector.broadcast %103 : vector<4x8x1xf32> to vector<4x8x4xf32>
    %105 = arith.mulf %99, %104 : vector<4x8x4xf32>
    %106 = vector.shape_cast %105 : vector<4x8x4xf32> to vector<32x4xf32>
    %cst_35 = arith.constant dense<0.000000e+00> : vector<32x8xf32>
    %107 = tpu.matmul %106, %71, %cst_35 {dimension_numbers = #tpu.dot_dimension_numbers<[1], [0], [0], [1], [0, 0, 1, 1], [], []>} : vector<32x4xf32>, vector<4x8xf32>, vector<32x8xf32> -> vector<32x8xf32>
    %108 = vector.shape_cast %107 : vector<32x8xf32> to vector<4x8x8xf32>
    %109 = arith.mulf %96, %103 : vector<4x8x1xf32>
    %110 = vector.broadcast %109 : vector<4x8x1xf32> to vector<4x8x8xf32>
    %111 = arith.mulf %110, %67 : vector<4x8x8xf32>
    %112 = arith.addf %111, %108 : vector<4x8x8xf32>
    %cst_36 = arith.constant dense<0xFF800000> : vector<4x8xf32>
    %113 = vector.multi_reduction <maximumf>, %68, %cst_36 [2] : vector<4x8x8xf32> to vector<4x8xf32>
    %114 = vector.shape_cast %113 : vector<4x8xf32> to vector<4x8x1xf32>
    %115 = vector.broadcast %114 : vector<4x8x1xf32> to vector<4x8x8xf32>
    %116 = arith.subf %68, %115 : vector<4x8x8xf32>
    %117 = math.exp %116 : vector<4x8x8xf32>
    %cst_37 = arith.constant dense<0.000000e+00> : vector<4x8xf32>
    %118 = vector.multi_reduction <add>, %117, %cst_37 [2] : vector<4x8x8xf32> to vector<4x8xf32>
    %119 = vector.shape_cast %118 : vector<4x8xf32> to vector<4x8x1xf32>
    %120 = tpu.reciprocal %119 : vector<4x8x1xf32> -> vector<4x8x1xf32>
    %121 = vector.broadcast %120 : vector<4x8x1xf32> to vector<4x8x8xf32>
    %122 = arith.mulf %117, %121 : vector<4x8x8xf32>
    "tpu.trace_start"() <{level = 10 : i32, message = "bij,bjd->bid"}> : () -> ()
    %cst_38 = arith.constant dense<0.000000e+00> : vector<4x8x8xf32>
    %123 = tpu.matmul %122, %112, %cst_38 {dimension_numbers = #tpu.dot_dimension_numbers<[2], [1], [1], [2], [0, 0, 0, 1, 1, 2], [0], [0]>} : vector<4x8x8xf32>, vector<4x8x8xf32>, vector<4x8x8xf32> -> vector<4x8x8xf32>
    "tpu.trace_stop"() : () -> ()
    %124 = vector.extract_strided_slice %0 {offsets = [0, 0, 16], sizes = [4, 8, 8], strides = [1, 1, 1]} : vector<4x8x32xf32> to vector<4x8x8xf32>
    %125 = vector.extract_strided_slice %1 {offsets = [0, 0, 16], sizes = [4, 8, 8], strides = [1, 1, 1]} : vector<4x8x32xf32> to vector<4x8x8xf32>
    %126 = vector.extract_strided_slice %2 {offsets = [0, 0, 16], sizes = [4, 8, 8], strides = [1, 1, 1]} : vector<4x8x32xf32> to vector<4x8x8xf32>
    "tpu.trace_start"() <{level = 10 : i32, message = "bid,bjd->bij"}> : () -> ()
    %cst_39 = arith.constant dense<0.000000e+00> : vector<4x8x8xf32>
    %127 = tpu.matmul %124, %125, %cst_39 {dimension_numbers = #tpu.dot_dimension_numbers<[2], [2], [1], [1], [0, 0, 0, 1, 1, 1], [0], [0]>} : vector<4x8x8xf32>, vector<4x8x8xf32>, vector<4x8x8xf32> -> vector<4x8x8xf32>
    "tpu.trace_stop"() : () -> ()
    %cst_40 = arith.constant dense<0.000000e+00> : vector<4x8xf32>
    %128 = vector.multi_reduction <add>, %126, %cst_40 [1] : vector<4x8x8xf32> to vector<4x8xf32>
    %cst_41 = arith.constant 8.000000e+00 : f32
    %129 = vector.broadcast %cst_41 : f32 to vector<4x8xf32>
    %130 = arith.divf %128, %129 : vector<4x8xf32>
    %131 = arith.mulf %126, %126 : vector<4x8x8xf32>
    %cst_42 = arith.constant dense<0.000000e+00> : vector<4x8xf32>
    %132 = vector.multi_reduction <add>, %131, %cst_42 [2] : vector<4x8x8xf32> to vector<4x8xf32>
    %133 = vector.shape_cast %132 : vector<4x8xf32> to vector<4x8x1xf32>
    %134 = vector.shape_cast %126 : vector<4x8x8xf32> to vector<32x8xf32>
    %cst_43 = arith.constant dense<0.000000e+00> : vector<32x4xf32>
    %135 = tpu.matmul %134, %130, %cst_43 {dimension_numbers = #tpu.dot_dimension_numbers<[1], [1], [0], [0], [0, 0, 1, 0], [], []>} : vector<32x8xf32>, vector<4x8xf32>, vector<32x4xf32> -> vector<32x4xf32>
    %136 = vector.shape_cast %135 : vector<32x4xf32> to vector<4x8x4xf32>
    %cst_44 = arith.constant 0xFF800000 : f32
    %137 = vector.broadcast %cst_44 : f32 to vector<4x8x4xf32>
    %138 = arith.select %5, %137, %136 : vector<4x8x4xi1>, vector<4x8x4xf32>
    %cst_45 = arith.constant dense<0xFF800000> : vector<4x8xf32>
    %139 = vector.multi_reduction <maximumf>, %138, %cst_45 [2] : vector<4x8x4xf32> to vector<4x8xf32>
    %140 = vector.shape_cast %139 : vector<4x8xf32> to vector<4x8x1xf32>
    %141 = vector.broadcast %140 : vector<4x8x1xf32> to vector<4x8x4xf32>
    %142 = arith.cmpf oge, %138, %141 : vector<4x8x4xf32>
    %cst_46 = arith.constant 0xFF800000 : f32
    %143 = vector.broadcast %cst_46 : f32 to vector<4x8x4xf32>
    %144 = arith.select %142, %143, %138 : vector<4x8x4xi1>, vector<4x8x4xf32>
    %cst_47 = arith.constant dense<0xFF800000> : vector<4x8xf32>
    %145 = vector.multi_reduction <maximumf>, %144, %cst_47 [2] : vector<4x8x4xf32> to vector<4x8xf32>
    %146 = vector.shape_cast %145 : vector<4x8xf32> to vector<4x8x1xf32>
    %147 = vector.broadcast %146 : vector<4x8x1xf32> to vector<4x8x4xf32>
    %148 = arith.cmpf oge, %138, %147 : vector<4x8x4xf32>
    %cst_48 = arith.constant 0xFF800000 : f32
    %149 = vector.broadcast %cst_48 : f32 to vector<4x8x4xf32>
    %150 = arith.select %148, %138, %149 : vector<4x8x4xi1>, vector<4x8x4xf32>
    %cst_49 = arith.constant dense<0xFF800000> : vector<4x8xf32>
    %151 = vector.multi_reduction <maximumf>, %150, %cst_49 [2] : vector<4x8x4xf32> to vector<4x8xf32>
    %152 = vector.shape_cast %151 : vector<4x8xf32> to vector<4x8x1xf32>
    %153 = arith.maximumf %133, %152 : vector<4x8x1xf32>
    %154 = arith.subf %133, %153 : vector<4x8x1xf32>
    %155 = math.exp %154 : vector<4x8x1xf32>
    %156 = vector.broadcast %153 : vector<4x8x1xf32> to vector<4x8x4xf32>
    %157 = arith.subf %150, %156 : vector<4x8x4xf32>
    %158 = math.exp %157 : vector<4x8x4xf32>
    %cst_50 = arith.constant dense<0.000000e+00> : vector<4x8xf32>
    %159 = vector.multi_reduction <add>, %158, %cst_50 [2] : vector<4x8x4xf32> to vector<4x8xf32>
    %160 = vector.shape_cast %159 : vector<4x8xf32> to vector<4x8x1xf32>
    %161 = arith.addf %155, %160 : vector<4x8x1xf32>
    %162 = tpu.reciprocal %161 : vector<4x8x1xf32> -> vector<4x8x1xf32>
    %163 = vector.broadcast %162 : vector<4x8x1xf32> to vector<4x8x4xf32>
    %164 = arith.mulf %158, %163 : vector<4x8x4xf32>
    %165 = vector.shape_cast %164 : vector<4x8x4xf32> to vector<32x4xf32>
    %cst_51 = arith.constant dense<0.000000e+00> : vector<32x8xf32>
    %166 = tpu.matmul %165, %130, %cst_51 {dimension_numbers = #tpu.dot_dimension_numbers<[1], [0], [0], [1], [0, 0, 1, 1], [], []>} : vector<32x4xf32>, vector<4x8xf32>, vector<32x8xf32> -> vector<32x8xf32>
    %167 = vector.shape_cast %166 : vector<32x8xf32> to vector<4x8x8xf32>
    %168 = arith.mulf %155, %162 : vector<4x8x1xf32>
    %169 = vector.broadcast %168 : vector<4x8x1xf32> to vector<4x8x8xf32>
    %170 = arith.mulf %169, %126 : vector<4x8x8xf32>
    %171 = arith.addf %170, %167 : vector<4x8x8xf32>
    %cst_52 = arith.constant dense<0xFF800000> : vector<4x8xf32>
    %172 = vector.multi_reduction <maximumf>, %127, %cst_52 [2] : vector<4x8x8xf32> to vector<4x8xf32>
    %173 = vector.shape_cast %172 : vector<4x8xf32> to vector<4x8x1xf32>
    %174 = vector.broadcast %173 : vector<4x8x1xf32> to vector<4x8x8xf32>
    %175 = arith.subf %127, %174 : vector<4x8x8xf32>
    %176 = math.exp %175 : vector<4x8x8xf32>
    %cst_53 = arith.constant dense<0.000000e+00> : vector<4x8xf32>
    %177 = vector.multi_reduction <add>, %176, %cst_53 [2] : vector<4x8x8xf32> to vector<4x8xf32>
    %178 = vector.shape_cast %177 : vector<4x8xf32> to vector<4x8x1xf32>
    %179 = tpu.reciprocal %178 : vector<4x8x1xf32> -> vector<4x8x1xf32>
    %180 = vector.broadcast %179 : vector<4x8x1xf32> to vector<4x8x8xf32>
    %181 = arith.mulf %176, %180 : vector<4x8x8xf32>
    "tpu.trace_start"() <{level = 10 : i32, message = "bij,bjd->bid"}> : () -> ()
    %cst_54 = arith.constant dense<0.000000e+00> : vector<4x8x8xf32>
    %182 = tpu.matmul %181, %171, %cst_54 {dimension_numbers = #tpu.dot_dimension_numbers<[2], [1], [1], [2], [0, 0, 0, 1, 1, 2], [0], [0]>} : vector<4x8x8xf32>, vector<4x8x8xf32>, vector<4x8x8xf32> -> vector<4x8x8xf32>
    "tpu.trace_stop"() : () -> ()
    %183 = vector.extract_strided_slice %0 {offsets = [0, 0, 24], sizes = [4, 8, 8], strides = [1, 1, 1]} : vector<4x8x32xf32> to vector<4x8x8xf32>
    %184 = vector.extract_strided_slice %1 {offsets = [0, 0, 24], sizes = [4, 8, 8], strides = [1, 1, 1]} : vector<4x8x32xf32> to vector<4x8x8xf32>
    %185 = vector.extract_strided_slice %2 {offsets = [0, 0, 24], sizes = [4, 8, 8], strides = [1, 1, 1]} : vector<4x8x32xf32> to vector<4x8x8xf32>
    "tpu.trace_start"() <{level = 10 : i32, message = "bid,bjd->bij"}> : () -> ()
    %cst_55 = arith.constant dense<0.000000e+00> : vector<4x8x8xf32>
    %186 = tpu.matmul %183, %184, %cst_55 {dimension_numbers = #tpu.dot_dimension_numbers<[2], [2], [1], [1], [0, 0, 0, 1, 1, 1], [0], [0]>} : vector<4x8x8xf32>, vector<4x8x8xf32>, vector<4x8x8xf32> -> vector<4x8x8xf32>
    "tpu.trace_stop"() : () -> ()
    %cst_56 = arith.constant dense<0.000000e+00> : vector<4x8xf32>
    %187 = vector.multi_reduction <add>, %185, %cst_56 [1] : vector<4x8x8xf32> to vector<4x8xf32>
    %cst_57 = arith.constant 8.000000e+00 : f32
    %188 = vector.broadcast %cst_57 : f32 to vector<4x8xf32>
    %189 = arith.divf %187, %188 : vector<4x8xf32>
    %190 = arith.mulf %185, %185 : vector<4x8x8xf32>
    %cst_58 = arith.constant dense<0.000000e+00> : vector<4x8xf32>
    %191 = vector.multi_reduction <add>, %190, %cst_58 [2] : vector<4x8x8xf32> to vector<4x8xf32>
    %192 = vector.shape_cast %191 : vector<4x8xf32> to vector<4x8x1xf32>
    %193 = vector.shape_cast %185 : vector<4x8x8xf32> to vector<32x8xf32>
    %cst_59 = arith.constant dense<0.000000e+00> : vector<32x4xf32>
    %194 = tpu.matmul %193, %189, %cst_59 {dimension_numbers = #tpu.dot_dimension_numbers<[1], [1], [0], [0], [0, 0, 1, 0], [], []>} : vector<32x8xf32>, vector<4x8xf32>, vector<32x4xf32> -> vector<32x4xf32>
    %195 = vector.shape_cast %194 : vector<32x4xf32> to vector<4x8x4xf32>
    %cst_60 = arith.constant 0xFF800000 : f32
    %196 = vector.broadcast %cst_60 : f32 to vector<4x8x4xf32>
    %197 = arith.select %5, %196, %195 : vector<4x8x4xi1>, vector<4x8x4xf32>
    %cst_61 = arith.constant dense<0xFF800000> : vector<4x8xf32>
    %198 = vector.multi_reduction <maximumf>, %197, %cst_61 [2] : vector<4x8x4xf32> to vector<4x8xf32>
    %199 = vector.shape_cast %198 : vector<4x8xf32> to vector<4x8x1xf32>
    %200 = vector.broadcast %199 : vector<4x8x1xf32> to vector<4x8x4xf32>
    %201 = arith.cmpf oge, %197, %200 : vector<4x8x4xf32>
    %cst_62 = arith.constant 0xFF800000 : f32
    %202 = vector.broadcast %cst_62 : f32 to vector<4x8x4xf32>
    %203 = arith.select %201, %202, %197 : vector<4x8x4xi1>, vector<4x8x4xf32>
    %cst_63 = arith.constant dense<0xFF800000> : vector<4x8xf32>
    %204 = vector.multi_reduction <maximumf>, %203, %cst_63 [2] : vector<4x8x4xf32> to vector<4x8xf32>
    %205 = vector.shape_cast %204 : vector<4x8xf32> to vector<4x8x1xf32>
    %206 = vector.broadcast %205 : vector<4x8x1xf32> to vector<4x8x4xf32>
    %207 = arith.cmpf oge, %197, %206 : vector<4x8x4xf32>
    %cst_64 = arith.constant 0xFF800000 : f32
    %208 = vector.broadcast %cst_64 : f32 to vector<4x8x4xf32>
    %209 = arith.select %207, %197, %208 : vector<4x8x4xi1>, vector<4x8x4xf32>
    %cst_65 = arith.constant dense<0xFF800000> : vector<4x8xf32>
    %210 = vector.multi_reduction <maximumf>, %209, %cst_65 [2] : vector<4x8x4xf32> to vector<4x8xf32>
    %211 = vector.shape_cast %210 : vector<4x8xf32> to vector<4x8x1xf32>
    %212 = arith.maximumf %192, %211 : vector<4x8x1xf32>
    %213 = arith.subf %192, %212 : vector<4x8x1xf32>
    %214 = math.exp %213 : vector<4x8x1xf32>
    %215 = vector.broadcast %212 : vector<4x8x1xf32> to vector<4x8x4xf32>
    %216 = arith.subf %209, %215 : vector<4x8x4xf32>
    %217 = math.exp %216 : vector<4x8x4xf32>
    %cst_66 = arith.constant dense<0.000000e+00> : vector<4x8xf32>
    %218 = vector.multi_reduction <add>, %217, %cst_66 [2] : vector<4x8x4xf32> to vector<4x8xf32>
    %219 = vector.shape_cast %218 : vector<4x8xf32> to vector<4x8x1xf32>
    %220 = arith.addf %214, %219 : vector<4x8x1xf32>
    %221 = tpu.reciprocal %220 : vector<4x8x1xf32> -> vector<4x8x1xf32>
    %222 = vector.broadcast %221 : vector<4x8x1xf32> to vector<4x8x4xf32>
    %223 = arith.mulf %217, %222 : vector<4x8x4xf32>
    %224 = vector.shape_cast %223 : vector<4x8x4xf32> to vector<32x4xf32>
    %cst_67 = arith.constant dense<0.000000e+00> : vector<32x8xf32>
    %225 = tpu.matmul %224, %189, %cst_67 {dimension_numbers = #tpu.dot_dimension_numbers<[1], [0], [0], [1], [0, 0, 1, 1], [], []>} : vector<32x4xf32>, vector<4x8xf32>, vector<32x8xf32> -> vector<32x8xf32>
    %226 = vector.shape_cast %225 : vector<32x8xf32> to vector<4x8x8xf32>
    %227 = arith.mulf %214, %221 : vector<4x8x1xf32>
    %228 = vector.broadcast %227 : vector<4x8x1xf32> to vector<4x8x8xf32>
    %229 = arith.mulf %228, %185 : vector<4x8x8xf32>
    %230 = arith.addf %229, %226 : vector<4x8x8xf32>
    %cst_68 = arith.constant dense<0xFF800000> : vector<4x8xf32>
    %231 = vector.multi_reduction <maximumf>, %186, %cst_68 [2] : vector<4x8x8xf32> to vector<4x8xf32>
    %232 = vector.shape_cast %231 : vector<4x8xf32> to vector<4x8x1xf32>
    %233 = vector.broadcast %232 : vector<4x8x1xf32> to vector<4x8x8xf32>
    %234 = arith.subf %186, %233 : vector<4x8x8xf32>
    %235 = math.exp %234 : vector<4x8x8xf32>
    %cst_69 = arith.constant dense<0.000000e+00> : vector<4x8xf32>
    %236 = vector.multi_reduction <add>, %235, %cst_69 [2] : vector<4x8x8xf32> to vector<4x8xf32>
    %237 = vector.shape_cast %236 : vector<4x8xf32> to vector<4x8x1xf32>
    %238 = tpu.reciprocal %237 : vector<4x8x1xf32> -> vector<4x8x1xf32>
    %239 = vector.broadcast %238 : vector<4x8x1xf32> to vector<4x8x8xf32>
    %240 = arith.mulf %235, %239 : vector<4x8x8xf32>
    "tpu.trace_start"() <{level = 10 : i32, message = "bij,bjd->bid"}> : () -> ()
    %cst_70 = arith.constant dense<0.000000e+00> : vector<4x8x8xf32>
    %241 = tpu.matmul %240, %230, %cst_70 {dimension_numbers = #tpu.dot_dimension_numbers<[2], [1], [1], [2], [0, 0, 0, 1, 1, 2], [0], [0]>} : vector<4x8x8xf32>, vector<4x8x8xf32>, vector<4x8x8xf32> -> vector<4x8x8xf32>
    "tpu.trace_stop"() : () -> ()
    %242 = tpu.concatenate %64, %123, %182, %241 in 2 : vector<4x8x8xf32>, vector<4x8x8xf32>, vector<4x8x8xf32>, vector<4x8x8xf32> -> vector<4x8x32xf32>
    %c0_71 = arith.constant 0 : index
    %c0_72 = arith.constant 0 : index
    %c0_73 = arith.constant 0 : index
    %243 = vector.load %arg3[%c0_71, %c0_72, %c0_73] : memref<4x8x32xf32, #tpu.memory_space<vmem>>, vector<4x8x32xf32>
    tpu.vector_store %arg3[%c0_71, %c0_72, %c0_73], %242 {strides = array<i32>} : memref<4x8x32xf32, #tpu.memory_space<vmem>>, vector<4x8x32xf32>,
    return
  }
}

</mosaic_0001>

<bundles_post_ra>
// kernel: tpu_custom_call.1
= control target key start
LH: loop header
LB: loop body
LE: loop exit
PB: predicated region body
PF: predicated region fallthrough
CT: control target
= control target key end

     0   :  { %8 = vsyncpa [#allocation3], 0  ;;  %s6139_s0 = inlined_call_operand.hbm [shape: f32[4,8,32], index: 0, kind: input, shape index: {}]   ;;  %s6140_s1 = inlined_call_operand.hbm [shape: f32[4,8,32], index: 1, kind: input, shape index: {}]   ;;  %s6141_s2 = inlined_call_operand.hbm [shape: f32[4,8,32], index: 2, kind: input, shape index: {}]   ;;  %s6142_s3 = inlined_call_operand.hbm [shape: f32[4,8,32], index: 3, kind: output, shape index: {}]  }
   0x1   :  { %9 = vsyncpa [#allocation6], 0 }
   0x2   :  { %10 = vsyncpa [#allocation4], 0  ;;  %s5078_s12 = smov [#allocation5]   ;;  %s5079_s14 = smov [#allocation2]  }
   0x3   :  { %s28_s13 = sshll.u32 %s5078_s12, 4  ;;  %s16_s15 = sshll.u32 %s5079_s14, 4  ;;  %s29_s13 = int_to_ptr.vmem [resolvable:$true] %s28_s13  ;;  %s17_s15 = int_to_ptr.vmem [resolvable:$true] %s16_s15 }
   0x4   :  { %s5000_s16 = scalar_lea.vmem %s29_s13, 512  ;;  %p5005_p1 = scmp.lt.s32.totalorder %s29_s13, %s29_s13 }
   0x5   :  { %p5001_p0 = scmp.ne.s32.totalorder %s29_s13, %s5000_s16  ;;  %p5006_p2 = scmp.lt.s32.totalorder %s5000_s16, %s5000_s16 }
   0x7   :  { %p5007_p3 = por %p5006_p2, %p5005_p1 }
   0x9   :  { %p5008_p4 = pnand %p5007_p3, %p5001_p0 }
   0xb   :  { %5011 = shalt.err (!%p5008_p4)
}
   0xc   :  { %s5080_s17 = smov 128   ;;  %s5081_s18 = smov 8  }
   0xd   :  { %34 = dma.hbm_to_vmem [thread:$0]  %s6140_s1, 512, %s29_s13, [#allocation6], %s5080_s17, %s5080_s17, %s5081_s18  }
   0xe   :  { %s5020_s21 = scalar_lea.vmem %s17_s15, 512  ;;  %p5025_p6 = scmp.lt.s32.totalorder %s17_s15, %s17_s15 }
   0xf   :  { %p5021_p5 = scmp.ne.s32.totalorder %s17_s15, %s5020_s21  ;;  %p5026_p7 = scmp.lt.s32.totalorder %s5020_s21, %s5020_s21 }
  0x11   :  { %p5027_p8 = por %p5026_p7, %p5025_p6 }
  0x13   :  { %p5028_p9 = pnand %p5027_p8, %p5021_p5 }
  0x15   :  { %5031 = shalt.err (!%p5028_p9)
}
  0x16   :  { %22 = dma.hbm_to_vmem [thread:$0]  %s6139_s0, 512, %s17_s15, [#allocation3], %s5080_s17, %s5080_s17, %s5081_s18  }
  0x17   :  { %s5082_s24 = smov [#allocation7]  }
  0x18   :  { %s40_s25 = sshll.u32 %s5082_s24, 4  ;;  %s41_s25 = int_to_ptr.vmem [resolvable:$true] %s40_s25 }
  0x19   :  { %s5040_s26 = scalar_lea.vmem %s41_s25, 512  ;;  %p5045_p11 = scmp.lt.s32.totalorder %s41_s25, %s41_s25 }
  0x1a   :  { %p5041_p10 = scmp.ne.s32.totalorder %s41_s25, %s5040_s26  ;;  %p5046_p12 = scmp.lt.s32.totalorder %s5040_s26, %s5040_s26 }
  0x1c   :  { %p5047_p13 = por %p5046_p12, %p5045_p11 }
  0x1e   :  { %p5048_p0 = pnand %p5047_p13, %p5041_p10 }
  0x20   :  { %5051 = shalt.err (!%p5048_p0)
}
  0x21   :  { %46 = dma.hbm_to_vmem [thread:$0]  %s6141_s2, 512, %s41_s25, [#allocation6], %s5080_s17, %s5080_s17, %s5081_s18  }
  0x22   :  { %5072 = dma.done.wait [#allocation3], 512  }
  0x23   :  { %5073 = vsyncadd [#allocation3], 4294966784 }
  0x24   :  { %5074 = dma.done.wait [#allocation6], 1024  }
  0x25   :  { %5075 = vsyncadd [#allocation6], 4294966272  ;;  %v5083_v0 = vmov 0.0   ;;  %vm5084_vm0 = vmmov 0   ;;  %vm74_vm1 = vcmask 64512   ;;  %v5135_v1 = vld [vmem:[#allocation5] sm:$0xff]  ;;  %v68_v48 = vlaneseq }
  0x26   :  { %4579 = vmatprep.subr.mxu0 %v5083_v0  ;;  %4581 = vmatprep.mubr.msk.f32.mxu0 %vm5084_vm0, %v5083_v0  ;;  %v5139_v2 = vld [vmem:[#allocation2] sm:$0xff]  ;;  %v5143_v4 = vld [vmem:[#allocation7 + $0x8] sm:$0xff]  ;;  %v5146_v5 = vld [vmem:[#allocation5 + $0x10] sm:$0xff]  ;;  %vm432_vm2 = vcmask 1041409   ;;  %vm434_vm3 = vcmask 1042434   ;;  %vm436_vm4 = vcmask 1043459  }
  0x27   :  { %4584 = vmatprep.subr.mxu1 %v5083_v0  ;;  %4586 = vmatprep.mubr.msk.f32.mxu1 %vm5084_vm0, %v5083_v0  ;;  %v5141_v3 = vld [vmem:[#allocation7] sm:$0xff]  ;;  %v5148_v6 = vld [vmem:[#allocation7 + $0x10] sm:$0xff]  ;;  %v5150_v7 = vld [vmem:[#allocation7 + $0x18] sm:$0xff]  ;;  %v386_v9 = vsel %vm74_vm1, %v5143_v4, 0.0  ;;  %v5194_v49 = vand.u32 127, %v68_v48  ;;  %vm541_vm7 = vcmask 31744  }
  0x28   :  { %4580 = vmatpush3.xpose.msk.msra.mxu0 %vm74_vm1, %v5135_v1  ;;  %v379_v8 = vsel %vm74_vm1, %v5141_v3, 0.0  ;;  %v387_v11 = vrot.slane %v386_v9, 4  ;;  %v393_v12 = vsel %vm74_vm1, %v5148_v6, 0.0  ;;  %v400_v13 = vsel %vm74_vm1, %v5150_v7, 0.0  ;;  %v5166_v16 = vld [vmem:[#allocation2 + $0x10] sm:$0xff]  ;;  %s5085_s0 = smov 120  }
  0x29   :  { %4589 = vmatprep.subr.mxu0 %v5083_v0  ;;  %v380_v10 = vrot.slane %v379_v8, 4  ;;  %v394_v14 = vrot.slane %v393_v12, 4  ;;  %v401_v15 = vrot.slane %v400_v13, 4  ;;  %vm70_vm5 = vcmp.eq.s32.totalorder %v5194_v49, 0  ;;  %s5086_s2 = smov 112   ;;  %s5087_s28 = smov 16  }
  0x2a   :  { %v388_v18 = vadd.f32 %v387_v11, %v386_v9  ;;  %vm71_vm6 = vcmp.eq.s32.totalorder %v5194_v49, 1  ;;  %vm73_vm8 = vcmp.eq.s32.totalorder %v5194_v49, 3  ;;  %vm72_vm9 = vcmp.eq.s32.totalorder %v5194_v49, 2  ;;  %s5088_s29 = smov 104   ;;  %s5089_s30 = smov 24  }
  0x2b   :  { %4582 = vmatmul.mubr.msk.f32.vlgmr.msra.gmra.mxu0 %vm74_vm1, %v5139_v2  ;;  %v381_v17 = vadd.f32 %v380_v10, %v379_v8  ;;  %v395_v19 = vadd.f32 %v394_v14, %v393_v12  ;;  %v402_v20 = vadd.f32 %v401_v15, %v400_v13  ;;  %s5090_s4 = smov [#allocation8]  }
  0x2c   :  { %4590 = vmatpush3.xpose.msk.msra.mxu0 %vm74_vm1, %v5146_v5  ;;  %4591 = vmatprep.mubr.msk.f32.mxu0 %vm5084_vm0, %v5083_v0  ;;  %v389_v22 = vrot.slane %v388_v18, 2  ;;  %s4374_s5 = sshll.u32 %s5090_s4, 4  ;;  %s4375_s5 = int_to_ptr.vmem [resolvable:$true] %s4374_s5 }
  0x2d   :  { %v382_v21 = vrot.slane %v381_v17, 2  ;;  %v396_v23 = vrot.slane %v395_v19, 2  ;;  %v403_v24 = vrot.slane %v402_v20, 2  ;;  %s5052_s6 = scalar_lea.vmem %s4375_s5, 512  ;;  %p5057_p2 = scmp.lt.s32.totalorder %s4375_s5, %s4375_s5 }
  0x2e   :  { %v390_v26 = vadd.f32 %v389_v22, %v388_v18  ;;  %p5053_p1 = scmp.ne.s32.totalorder %s4375_s5, %s5052_s6  ;;  %p5058_p3 = scmp.lt.s32.totalorder %s5052_s6, %s5052_s6 }
  0x2f   :  { %4592 = vmatmul.mubr.msk.f32.vlgmr.msra.gmra.mxu0 %vm74_vm1, %v5166_v16  ;;  %v383_v25 = vadd.f32 %v382_v21, %v381_v17  ;;  %v397_v27 = vadd.f32 %v396_v23, %v395_v19  ;;  %v404_v28 = vadd.f32 %v403_v24, %v402_v20  ;;  %v5218_v19 = vmul.f32 %v5141_v3, %v5141_v3 }
  0x30   :  { %4601 = vmatprep.mubr.msk.f32.mxu0 %vm74_vm1, %v5141_v3  ;;  %v391_v30 = vrot.slane %v390_v26, 1  ;;  %v5224_v21 = vmul.f32 %v5143_v4, %v5143_v4  ;;  %v5230_v23 = vmul.f32 %v5148_v6, %v5148_v6  ;;  %p5059_p4 = por %p5058_p3, %p5057_p2 }
  0x31   :  { %v384_v29 = vrot.slane %v383_v25, 1  ;;  %v398_v31 = vrot.slane %v397_v27, 1  ;;  %v405_v32 = vrot.slane %v404_v28, 1  ;;  %v416_v20 = vsel %vm74_vm1, %v5218_v19, 0.0 }
  0x32   :  { %v392_v34 = vadd.f32 %v391_v30, %v390_v26  ;;  %v419_v22 = vsel %vm74_vm1, %v5224_v21, 0.0  ;;  %v422_v24 = vsel %vm74_vm1, %v5230_v23, 0.0  ;;  %p5060_p5 = pnand %p5059_p4, %p5053_p1 }
  0x33   :  { %v385_v33 = vadd.f32 %v384_v29, %v383_v25  ;;  %v399_v35 = vadd.f32 %v398_v31, %v397_v27  ;;  %v406_v36 = vadd.f32 %v405_v32, %v404_v28  ;;  %v5236_v25 = vmul.f32 %v5150_v7, %v5150_v7 }
  0x34   :  { %v409_v38 = vmul.f32 0.125, %v392_v34 }
  0x35   :  { %v408_v37 = vmul.f32 0.125, %v385_v33  ;;  %v410_v39 = vmul.f32 0.125, %v399_v35  ;;  %v411_v40 = vmul.f32 0.125, %v406_v36  ;;  %v425_v26 = vsel %vm74_vm1, %v5236_v25, 0.0 }
  0x37   :  { %v433_v41 = vsel %vm432_vm2, %v409_v38, %v408_v37 }
  0x38   :  { %v435_v42 = vsel %vm434_vm3, %v410_v39, %v433_v41 }
  0x39   :  { %v5175_v43 = vsel %vm436_vm4, %v411_v40, %v435_v42 }
  0x3a   :  { %4599 = vmatprep.subr.msk.mxu0 %vm74_vm1, %v5175_v43 }
  0x3b   :  { %4600 = vmatpush3.xpose.msk.msra.mxu0 %vm74_vm1, %v5175_v43 }
  0x3c   :  { %4615 = vmatprep.subr.mxu0 %v5083_v0 }
  0x3e   :  { %4602 = vmatmul.mubr.msk.f32.vlgmr.msra.gmra.mxu0 %vm74_vm1, %v5143_v4 }
  0x3f   :  { %4604 = vmatprep.mubr.msk.f32.mxu0 %vm74_vm1, %v5148_v6 }
  0x42   :  { %4605 = vmatmul.mubr.msk.f32.gmra.mxu0 %vm74_vm1, %v5150_v7 }
  0x43   :  { %4617 = vmatprep.mubr.msk.f32.mxu0 %vm5084_vm0, %v5083_v0 }
  0xeb   :  { %v5190_v44 = vpop.f32.mrf.mxu0 }
  0xed   :  { %v4583_v45 = vpop.f32.mrf.mxu0 }
  0xef   :  { %v5192_v46 = vpop.f32.mrf.mxu0 }
  0xf1   :  { %v4593_v47 = vpop.f32.mrf.mxu0 }
  0xfe   :  { %v4603_v50 = vpop.f32.mrf.mxu0 }
  0xff   :  { %v538_v55 = vsel %vm71_vm6, -inf, %v4603_v50 }
 0x100   :  { %v518_v51 = vpop.f32.mrf.mxu0  ;;  %v545_v59 = vsel %vm541_vm7, %v538_v55, -inf }
 0x101   :  { %v537_v52 = vsel %vm70_vm5, -inf, %v518_v51 }
 0x102   :  { %v4606_v53 = vpop.f32.mrf.mxu0  ;;  %v542_v54 = vsel %vm541_vm7, %v537_v52, -inf }
 0x103   :  { %543 = vmax.xlane.f32.xlu0 %v542_v54  ;;  %v540_v57 = vsel %vm73_vm8, -inf, %v4606_v53 }
 0x104   :  { %v528_v56 = vpop.f32.mrf.mxu0  ;;  %v551_v61 = vsel %vm541_vm7, %v540_v57, -inf }
 0x105   :  { %v539_v58 = vsel %vm72_vm9, -inf, %v528_v56 }
 0x106   :  { %v548_v60 = vsel %vm541_vm7, %v539_v58, -inf }
 0x107   :  { %546 = vmax.xlane.f32.xlu0 %v545_v59  ;;  %549 = vmax.xlane.f32.xlu1 %v548_v60 }
 0x10b   :  { %552 = vmax.xlane.f32.xlu1 %v551_v61 }
 0x18c   :  { %v544_v62 = vpop.xlane.xlu0 %543 }
 0x18d   :  { %vm554_vm10 = vcmp.ge.f32.partialorder %v537_v52, %v544_v62 }
 0x18e   :  { %v558_v63 = vsel %vm554_vm10, -inf, %v537_v52 }
 0x18f   :  { %v562_v8 = vsel %vm541_vm7, %v558_v63, -inf }
 0x190   :  { %563 = vmax.xlane.f32.xlu0 %v562_v8  ;;  %v547_v9 = vpop.xlane.xlu0 %546  ;;  %v550_v10 = vpop.xlane.xlu1 %549 }
 0x191   :  { %vm555_vm11 = vcmp.ge.f32.partialorder %v538_v55, %v547_v9  ;;  %vm556_vm12 = vcmp.ge.f32.partialorder %v539_v58, %v550_v10 }
 0x192   :  { %v559_v11 = vsel %vm555_vm11, -inf, %v538_v55  ;;  %v560_v12 = vsel %vm556_vm12, -inf, %v539_v58  ;;  %vm658_vm12 = vcmask 1043456  }
 0x193   :  { %v565_v13 = vsel %vm541_vm7, %v559_v11, -inf  ;;  %v568_v14 = vsel %vm541_vm7, %v560_v12, -inf }
 0x194   :  { %566 = vmax.xlane.f32.xlu1 %v565_v13  ;;  %569 = vmax.xlane.f32.xlu0 %v568_v14  ;;  %v553_v15 = vpop.xlane.xlu1 %552  ;;  %v758_v14 = vsel %vm74_vm1, %v5190_v44, -inf }
 0x195   :  { %vm557_vm13 = vcmp.ge.f32.partialorder %v540_v57, %v553_v15 }
 0x196   :  { %v561_v17 = vsel %vm557_vm13, -inf, %v540_v57  ;;  %vm1406_vm13 = vcmask 130112  }
 0x197   :  { %v571_v18 = vsel %vm541_vm7, %v561_v17, -inf  ;;  %v764_v17 = vsel %vm74_vm1, %v5192_v46, -inf }
 0x198   :  { %572 = vmax.xlane.f32.xlu1 %v571_v18  ;;  %417 = vadd.xlane.f32.xlu0 %v416_v20  ;;  %v5264_v18 = vld [vmem:[#allocation5 + $0x8] sm:$0xff] }
 0x199   :  { %4585 = vmatpush3.xpose.msk.msra.mxu1 %vm74_vm1, %v5264_v18  ;;  %v5269_v20 = vld [vmem:[#allocation2 + $0x8] sm:$0xff] }
 0x19a   :  { %4594 = vmatprep.subr.mxu1 %v5083_v0 }
 0x19c   :  { %420 = vadd.xlane.f32.xlu0 %v419_v22  ;;  %4587 = vmatmul.mubr.msk.f32.vlgmr.msra.gmra.mxu1 %vm74_vm1, %v5269_v20  ;;  %v5273_v22 = vld [vmem:[#allocation5 + $0x18] sm:$0xff] }
 0x19d   :  { %4595 = vmatpush3.xpose.msk.msra.mxu1 %vm74_vm1, %v5273_v22  ;;  %4596 = vmatprep.mubr.msk.f32.mxu1 %vm5084_vm0, %v5083_v0 }
 0x19e   :  { %4607 = vmatprep.subr.msk.mxu1 %vm658_vm12, %v5175_v43 }
 0x1a0   :  { %423 = vadd.xlane.f32.xlu0 %v422_v24  ;;  %v5279_v24 = vld [vmem:[#allocation2 + $0x18] sm:$0xff] }
 0x1a1   :  { %4597 = vmatmul.mubr.msk.f32.vlgmr.msra.gmra.mxu1 %vm74_vm1, %v5279_v24 }
 0x1a2   :  { %4608 = vmatpush3.msk.msra.mxu1 %vm658_vm12, %v5175_v43 }
 0x1a3   :  { %4620 = vmatprep.subr.mxu1 %v5083_v0 }
 0x1a4   :  { %426 = vadd.xlane.f32.xlu0 %v425_v26 }
 0x219   :  { %v564_v27 = vpop.xlane.xlu0 %563 }
 0x21a   :  { %vm574_vm14 = vcmp.ge.f32.partialorder %v537_v52, %v564_v27 }
 0x21b   :  { %v578_v32 = vsel %vm574_vm14, %v537_v52, -inf }
 0x21c   :  { %v582_v34 = vsel %vm541_vm7, %v578_v32, -inf }
 0x21d   :  { %v567_v28 = vpop.xlane.xlu1 %566  ;;  %v570_v29 = vpop.xlane.xlu0 %569 }
 0x21e   :  { %vm575_vm15 = vcmp.ge.f32.partialorder %v538_v55, %v567_v28  ;;  %vm576_vm10 = vcmp.ge.f32.partialorder %v539_v58, %v570_v29 }
 0x21f   :  { %v579_v30 = vsel %vm575_vm15, %v538_v55, -inf  ;;  %v580_v35 = vsel %vm576_vm10, %v539_v58, -inf }
 0x220   :  { %v585_v31 = vsel %vm541_vm7, %v579_v30, -inf  ;;  %v588_v36 = vsel %vm541_vm7, %v580_v35, -inf }
 0x221   :  { %586 = vmax.xlane.f32.xlu1 %v585_v31  ;;  %v573_v33 = vpop.xlane.xlu1 %572  ;;  %v418_v39 = vpop.xlane.xlu0 %417 }
 0x222   :  { %vm577_vm11 = vcmp.ge.f32.partialorder %v540_v57, %v573_v33 }
 0x223   :  { %v581_v37 = vsel %vm577_vm11, %v540_v57, -inf }
 0x224   :  { %v591_v38 = vsel %vm541_vm7, %v581_v37, -inf }
 0x225   :  { %583 = vmax.xlane.f32.xlu1 %v582_v34  ;;  %v421_v40 = vpop.xlane.xlu0 %420 }
 0x229   :  { %589 = vmax.xlane.f32.xlu1 %v588_v36  ;;  %v424_v48 = vpop.xlane.xlu0 %423 }
 0x22d   :  { %592 = vmax.xlane.f32.xlu1 %v591_v38  ;;  %v427_v56 = vpop.xlane.xlu0 %426 }
 0x2aa   :  { %v587_v41 = vpop.xlane.xlu1 %586 }
 0x2ab   :  { %v595_v42 = vmax.f32 %v421_v40, %v587_v41 }
 0x2ad   :  { %v611_v45 = vsub.f32 %v579_v30, %v595_v42  ;;  %v599_v26 = vsub.f32 %v421_v40, %v595_v42 }
 0x2ae   :  { %v584_v47 = vpop.xlane.xlu1 %583 }
 0x2af   :  { %v616_v50 = vmul.f32 1.442695, %v611_v45  ;;  %v594_v51 = vmax.f32 %v418_v39, %v584_v47  ;;  %v604_v27 = vmul.f32 1.442695, %v599_v26 }
 0x2b1   :  { %v610_v52 = vsub.f32 %v578_v32, %v594_v51  ;;  %4816 = vpow2.f32 %v616_v50  ;;  %v598_v28 = vsub.f32 %v418_v39, %v594_v51 }
 0x2b2   :  { %v590_v53 = vpop.xlane.xlu1 %589 }
 0x2b3   :  { %v614_v54 = vmul.f32 1.442695, %v610_v52  ;;  %v596_v55 = vmax.f32 %v424_v48, %v590_v53  ;;  %v602_v29 = vmul.f32 1.442695, %v598_v28 }
 0x2b5   :  { %v612_v58 = vsub.f32 %v580_v35, %v596_v55  ;;  %4818 = vpow2.f32 %v614_v54  ;;  %v600_v30 = vsub.f32 %v424_v48, %v596_v55  ;;  %v1407_v55 = vsel %vm1406_vm13, %v5141_v3, 0.0 }
 0x2b6   :  { %v593_v57 = vpop.xlane.xlu1 %592 }
 0x2b7   :  { %v618_v59 = vmul.f32 1.442695, %v612_v58  ;;  %v597_v60 = vmax.f32 %v427_v56, %v593_v57  ;;  %v606_v31 = vmul.f32 1.442695, %v600_v30  ;;  %v1414_v58 = vsel %vm1406_vm13, %v5143_v4, 0.0 }
 0x2b9   :  { %v613_v61 = vsub.f32 %v581_v37, %v597_v60  ;;  %4820 = vpow2.f32 %v618_v59  ;;  %v601_v32 = vsub.f32 %v427_v56, %v597_v60  ;;  %v1421_v60 = vsel %vm1406_vm13, %v5148_v6, 0.0 }
 0x2bb   :  { %v620_v62 = vmul.f32 1.442695, %v613_v61  ;;  %v608_v33 = vmul.f32 1.442695, %v601_v32 }
 0x2bd   :  { %4822 = vpow2.f32 %v620_v62  ;;  %v1415_v62 = vrot.slane %v1414_v58, 4 }
 0x2be   :  { %v5244_v63 = vpop.eup %4816  ;;  %4824 = vpow2.f32 %v604_v27 }
 0x2bf   :  { %v625_v8 = vsel %vm541_vm7, %v5244_v63, 0.0  ;;  %4826 = vpow2.f32 %v602_v29  ;;  %v1416_v26 = vadd.f32 %v1415_v62, %v1414_v58 }
 0x2c0   :  { %626 = vadd.xlane.f32.xlu1 %v625_v8  ;;  %4828 = vpow2.f32 %v606_v31 }
 0x2c1   :  { %4830 = vpow2.f32 %v608_v33  ;;  %v1417_v31 = vrot.slane %v1416_v26, 2 }
 0x2c2   :  { %v5248_v9 = vpop.eup %4818 }
 0x2c3   :  { %v622_v10 = vsel %vm541_vm7, %v5248_v9, 0.0 }
 0x2c4   :  { %623 = vadd.xlane.f32.xlu0 %v622_v10 }
 0x2c6   :  { %v5252_v11 = vpop.eup %4820 }
 0x2c7   :  { %v628_v12 = vsel %vm541_vm7, %v5252_v11, 0.0 }
 0x2c8   :  { %629 = vadd.xlane.f32.xlu0 %v628_v12  ;;  %v1422_v12 = vrot.slane %v1421_v60, 4 }
 0x2ca   :  { %v5256_v13 = vpop.eup %4822 }
 0x2cb   :  { %v631_v15 = vsel %vm541_vm7, %v5256_v13, 0.0  ;;  %v4825_v34 = vpop.eup %4824 }
 0x2cc   :  { %759 = vmax.xlane.f32.xlu0 %v758_v14  ;;  %632 = vadd.xlane.f32.xlu1 %v631_v15  ;;  %v4827_v37 = vpop.eup %4826  ;;  %v1428_v14 = vsel %vm1406_vm13, %v5150_v7, 0.0 }
 0x2cd   :  { %v4829_v40 = vpop.eup %4828 }
 0x2ce   :  { %v4831_v42 = vpop.eup %4830 }
 0x2d0   :  { %765 = vmax.xlane.f32.xlu1 %v764_v17 }
 0x349   :  { %v627_v35 = vpop.xlane.xlu1 %626 }
 0x34a   :  { %v635_v36 = vadd.f32 %v4825_v34, %v627_v35 }
 0x34c   :  { %4832 = vrcp.f32 %v635_v36 }
 0x34d   :  { %v624_v43 = vpop.xlane.xlu0 %623 }
 0x34e   :  { %v634_v38 = vadd.f32 %v4827_v37, %v624_v43 }
 0x350   :  { %4834 = vrcp.f32 %v634_v38 }
 0x351   :  { %v630_v41 = vpop.xlane.xlu0 %629 }
 0x352   :  { %v636_v39 = vadd.f32 %v4829_v40, %v630_v41 }
 0x354   :  { %4836 = vrcp.f32 %v636_v39 }
 0x355   :  { %v760_v45 = vpop.xlane.xlu0 %759  ;;  %v633_v47 = vpop.xlane.xlu1 %632 }
 0x356   :  { %v770_v48 = vsub.f32 %v5190_v44, %v760_v45  ;;  %v637_v50 = vadd.f32 %v4831_v42, %v633_v47  ;;  %v1408_v44 = vrot.slane %v1407_v55, 4 }
 0x358   :  { %v774_v51 = vmul.f32 1.442695, %v770_v48  ;;  %4838 = vrcp.f32 %v637_v50  ;;  %v1409_v17 = vadd.f32 %v1408_v44, %v1407_v55 }
 0x359   :  { %v4833_v52 = vpop.eup %4832  ;;  %v766_v53 = vpop.xlane.xlu1 %765 }
 0x35a   :  { %4840 = vpow2.f32 %v774_v51  ;;  %v772_v54 = vsub.f32 %v5192_v46, %v766_v53  ;;  %v5292_v56 = vmul.f32 %v4833_v52, %v4825_v34  ;;  %v643_v46 = vmul.f32 %v4833_v52, %v5244_v63 }
 0x35b   :  { %v1423_v63 = vadd.f32 %v1422_v12, %v1421_v60  ;;  %v1410_v30 = vrot.slane %v1409_v17, 2 }
 0x35c   :  { %v778_v57 = vmul.f32 1.442695, %v772_v54  ;;  %v751_v62 = vmul.f32 %v5292_v56, %v5143_v4 }
 0x35d   :  { %v4835_v59 = vpop.eup %4834  ;;  %v1424_v35 = vrot.slane %v1423_v63, 2  ;;  %v1411_v36 = vadd.f32 %v1410_v30, %v1409_v17 }
 0x35e   :  { %4842 = vpow2.f32 %v778_v57  ;;  %v642_v61 = vmul.f32 %v4835_v59, %v5248_v9  ;;  %v5299_v8 = vmul.f32 %v4835_v59, %v4827_v37  ;;  %v1429_v9 = vrot.slane %v1428_v14, 4 }
 0x35f   :  { %v1418_v37 = vadd.f32 %v1417_v31, %v1416_v26  ;;  %v1412_v41 = vrot.slane %v1411_v36, 1 }
 0x360   :  { %4609 = vmatprep.mubr.msk.f32.mxu1 %vm541_vm7, %v642_v61  ;;  %v1430_v34 = vadd.f32 %v1429_v9, %v1428_v14 }
 0x361   :  { %v4837_v10 = vpop.eup %4836  ;;  %4610 = vmatmul.mubr.msk.f32.vlgmr.msra.gmra.mxu1 %vm541_vm7, %v643_v46  ;;  %v1419_v39 = vrot.slane %v1418_v37, 1  ;;  %v1413_v47 = vadd.f32 %v1412_v41, %v1411_v36 }
 0x362   :  { %v644_v15 = vmul.f32 %v4837_v10, %v5252_v11  ;;  %v5307_v27 = vmul.f32 %v4837_v10, %v4829_v40  ;;  %v1431_v38 = vrot.slane %v1430_v34, 2  ;;  %v1425_v40 = vadd.f32 %v1424_v35, %v1423_v63 }
 0x363   :  { %v1420_v48 = vadd.f32 %v1419_v39, %v1418_v37  ;;  %v1435_v52 = vmul.f32 0.125, %v1413_v47 }
 0x364   :  { %4612 = vmatprep.mubr.msk.f32.mxu1 %vm541_vm7, %v644_v15  ;;  %v1426_v45 = vrot.slane %v1425_v40, 1  ;;  %v750_v15 = vmul.f32 %v5299_v8, %v5141_v3  ;;  %v752_v63 = vmul.f32 %v5307_v27, %v5148_v6 }
 0x365   :  { %v4839_v28 = vpop.eup %4838  ;;  %v1436_v53 = vmul.f32 0.125, %v1420_v48 }
 0x366   :  { %v645_v29 = vmul.f32 %v4839_v28, %v5256_v13  ;;  %v5311_v32 = vmul.f32 %v4839_v28, %v4831_v42  ;;  %v1432_v42 = vadd.f32 %v1431_v38, %v1430_v34  ;;  %v1427_v51 = vadd.f32 %v1426_v45, %v1425_v40 }
 0x367   :  { %v4841_v33 = vpop.eup %4840  ;;  %v1479_v58 = vsel %vm432_vm2, %v1436_v53, %v1435_v52 }
 0x368   :  { %4613 = vmatmul.mubr.msk.f32.gmra.mxu1 %vm541_vm7, %v645_v29  ;;  %v782_v11 = vsel %vm74_vm1, %v4841_v33, 0.0  ;;  %v1433_v50 = vrot.slane %v1432_v42, 1  ;;  %v1437_v55 = vmul.f32 0.125, %v1427_v51 }
 0x369   :  { %783 = vadd.xlane.f32.xlu0 %v782_v11  ;;  %4622 = vmatprep.mubr.msk.f32.mxu1 %vm5084_vm0, %v5083_v0 }
 0x36a   :  { %v1434_v54 = vadd.f32 %v1433_v50, %v1432_v42  ;;  %v1480_v59 = vsel %vm434_vm3, %v1437_v55, %v1479_v58 }
 0x36b   :  { %v5317_v43 = vpop.eup %4842 }
 0x36c   :  { %v788_v13 = vsel %vm74_vm1, %v5317_v43, 0.0  ;;  %v1438_v57 = vmul.f32 0.125, %v1434_v54 }
 0x36d   :  { %789 = vadd.xlane.f32.xlu1 %v788_v13 }
 0x36e   :  { %v1481_v44 = vsel %vm436_vm4, %v1438_v57, %v1480_v59 }
 0x37e   :  { %1094 = vrot.lane.b32.xlu1 %v5139_v2, %s5085_s0 }
 0x37f   :  { %1096 = vrot.lane.b32.xlu0 %v5135_v1, %s5085_s0  ;;  %v5341_v1 = vpop.f32.mrf.mxu1 }
 0x381   :  { %v4588_v2 = vpop.f32.mrf.mxu1 }
 0x382   :  { %1252 = vrot.lane.b32.xlu1 %v5146_v5, %s5085_s0 }
 0x383   :  { %1482 = vrot.lane.b32.xlu0 %v1481_v44, %s5085_s0  ;;  %v5343_v5 = vpop.f32.mrf.mxu1 }
 0x385   :  { %v4598_v60 = vpop.f32.mrf.mxu1 }
 0x386   :  { %1250 = vrot.lane.b32.xlu1 %v5166_v16, %s5085_s0 }
 0x387   :  { %1469 = vrot.lane.b32.xlu0 %v5143_v4, %s5085_s0  ;;  %v753_v4 = vmul.f32 %v5311_v32, %v5150_v7 }
 0x38a   :  { %1467 = vrot.lane.b32.xlu1 %v5141_v3, %s5085_s0 }
 0x38b   :  { %1473 = vrot.lane.b32.xlu0 %v5150_v7, %s5085_s0 }
 0x38e   :  { %1471 = vrot.lane.b32.xlu1 %v5148_v6, %s5085_s0 }
 0x3f2   :  { %v784_v61 = vpop.xlane.xlu0 %783 }
 0x3f3   :  { %4844 = vrcp.f32 %v784_v61 }
 0x3f6   :  { %v790_v16 = vpop.xlane.xlu1 %789  ;;  %v1097_v31 = vpop.permute.xlu0 %1096 }
 0x3f7   :  { %4846 = vrcp.f32 %v790_v16 }
 0x3fa   :  { %v1095_v46 = vpop.permute.xlu1 %1094  ;;  %v5366_v7 = vpop.permute.xlu0 %1482 }
 0x3fe   :  { %v1253_v28 = vpop.permute.xlu1 %1252  ;;  %v1470_v27 = vpop.permute.xlu0 %1469 }
 0x400   :  { %v4845_v12 = vpop.eup %4844 }
 0x401   :  { %v798_v9 = vmul.f32 %v4845_v12, %v4841_v33 }
 0x402   :  { %v1251_v11 = vpop.permute.xlu1 %1250  ;;  %v1474_v34 = vpop.permute.xlu0 %1473 }
 0x404   :  { %v4847_v3 = vpop.eup %4846 }
 0x405   :  { %v800_v33 = vmul.f32 %v4847_v3, %v5317_v43 }
 0x406   :  { %v1468_v6 = vpop.permute.xlu1 %1467 }
 0x40a   :  { %v1472_v32 = vpop.permute.xlu1 %1471 }
 0x421   :  { %v4611_v10 = vpop.f32.mrf.mxu1 }
 0x422   :  { %v755_v14 = vadd.f32 %v4611_v10, %v751_v62 }
 0x423   :  { %v727_v17 = vpop.f32.mrf.mxu1 }
 0x424   :  { %v754_v26 = vadd.f32 %v750_v15, %v727_v17  ;;  %4621 = vmatpush3.msra.mxu1 %v755_v14  ;;  %v767_v17 = vsel %vm74_vm1, %v5343_v5, -inf }
 0x425   :  { %4630 = vmatprep.subr.mxu1 %v5083_v0 }
 0x426   :  { %4616 = vmatpush3.msra.mxu0 %v754_v26 }
 0x427   :  { %4618 = vmatmul.mubr.msk.f32.vlgmr.msra.gmra.mxu0 %vm74_vm1, %v798_v9  ;;  %4625 = vmatprep.subr.mxu0 %v5083_v0  ;;  %v761_v9 = vsel %vm74_vm1, %v5341_v1, -inf }
 0x428   :  { %v4614_v56 = vpop.f32.mrf.mxu1  ;;  %4627 = vmatprep.mubr.msk.f32.mxu0 %vm5084_vm0, %v5083_v0 }
 0x429   :  { %v5356_v8 = vadd.f32 %v4614_v56, %v753_v4 }
 0x42a   :  { %v737_v29 = vpop.f32.mrf.mxu1 }
 0x42b   :  { %v756_v30 = vadd.f32 %v752_v63, %v737_v29 }
 0x42d   :  { %4626 = vmatpush3.msra.mxu0 %v756_v30 }
 0x42e   :  { %4628 = vmatmul.mubr.msk.f32.vlgmr.msra.gmra.mxu0 %vm74_vm1, %v800_v33  ;;  %4635 = vmatprep.subr.mxu0 %v5083_v0 }
 0x42f   :  { %4636 = vmatpush3.xpose.msk.msra.mxu0 %vm74_vm1, %v1097_v31  ;;  %4637 = vmatprep.mubr.msk.f32.mxu0 %vm5084_vm0, %v5083_v0 }
 0x430   :  { %4645 = vmatprep.subr.mxu0 %v5083_v0 }
 0x432   :  { %4638 = vmatmul.mubr.msk.f32.vlgmr.msra.gmra.mxu0 %vm74_vm1, %v1095_v46 }
 0x433   :  { %4646 = vmatpush3.xpose.msk.msra.mxu0 %vm74_vm1, %v1253_v28  ;;  %4647 = vmatprep.mubr.msk.f32.mxu0 %vm5084_vm0, %v5083_v0 }
 0x434   :  { %4655 = vmatprep.subr.msk.mxu0 %vm74_vm1, %v5366_v7 }
 0x436   :  { %4648 = vmatmul.mubr.msk.f32.vlgmr.msra.gmra.mxu0 %vm74_vm1, %v1251_v11 }
 0x437   :  { %4656 = vmatpush3.xpose.msk.msra.mxu0 %vm74_vm1, %v5366_v7  ;;  %4657 = vmatprep.mubr.msk.f32.mxu0 %vm74_vm1, %v1468_v6 }
 0x438   :  { %4671 = vmatprep.subr.mxu0 %v5083_v0 }
 0x43a   :  { %4658 = vmatmul.mubr.msk.f32.vlgmr.msra.gmra.mxu0 %vm74_vm1, %v1470_v27 }
 0x43b   :  { %4660 = vmatprep.mubr.msk.f32.mxu0 %vm74_vm1, %v1472_v32 }
 0x43e   :  { %4661 = vmatmul.mubr.msk.f32.gmra.mxu0 %vm74_vm1, %v1474_v34 }
 0x43f   :  { %4673 = vmatprep.mubr.msk.f32.mxu0 %vm5084_vm0, %v5083_v0 }
 0x4e7   :  { %v5385_v35 = vpop.f32.mrf.mxu0 }
 0x4e9   :  { %v4619_v36 = vpop.f32.mrf.mxu0 }
 0x4ee   :  { %v5387_v37 = vpop.f32.mrf.mxu0 }
 0x4f0   :  { %v4629_v43 = vpop.f32.mrf.mxu0 }
 0x4f2   :  { %v5389_v13 = vpop.f32.mrf.mxu0 }
 0x4f4   :  { %v4639_v38 = vpop.f32.mrf.mxu0 }
 0x4f6   :  { %v5391_v40 = vpop.f32.mrf.mxu0 }
 0x4f8   :  { %v4649_v41 = vpop.f32.mrf.mxu0 }
 0x4fa   :  { %v4659_v39 = vpop.f32.mrf.mxu0 }
 0x4fb   :  { %v1580_v42 = vsel %vm71_vm6, -inf, %v4659_v39 }
 0x4fc   :  { %v1560_v45 = vpop.f32.mrf.mxu0  ;;  %v1586_v47 = vsel %vm541_vm7, %v1580_v42, -inf }
 0x4fd   :  { %v1579_v48 = vsel %vm70_vm5, -inf, %v1560_v45  ;;  %1587 = vmax.xlane.f32.xlu0 %v1586_v47 }
 0x4fe   :  { %v4662_v50 = vpop.f32.mrf.mxu0  ;;  %v1583_v51 = vsel %vm541_vm7, %v1579_v48, -inf }
 0x4ff   :  { %1584 = vmax.xlane.f32.xlu1 %v1583_v51  ;;  %v1582_v53 = vsel %vm73_vm8, -inf, %v4662_v50 }
 0x500   :  { %v1570_v52 = vpop.f32.mrf.mxu0  ;;  %v1592_v58 = vsel %vm541_vm7, %v1582_v53, -inf }
 0x501   :  { %v1581_v54 = vsel %vm72_vm9, -inf, %v1570_v52 }
 0x502   :  { %v1589_v55 = vsel %vm541_vm7, %v1581_v54, -inf }
 0x503   :  { %1590 = vmax.xlane.f32.xlu0 %v1589_v55 }
 0x507   :  { %1593 = vmax.xlane.f32.xlu0 %v1592_v58 }
 0x510   :  { %1443 = vrot.lane.b32.xlu1 %v5218_v19, %s5085_s0 }
 0x586   :  { %v1588_v57 = vpop.xlane.xlu0 %1587 }
 0x587   :  { %vm1596_vm14 = vcmp.ge.f32.partialorder %v1580_v42, %v1588_v57 }
 0x588   :  { %v1585_v59 = vpop.xlane.xlu1 %1584  ;;  %v1600_v44 = vsel %vm1596_vm14, -inf, %v1580_v42 }
 0x589   :  { %vm1595_vm15 = vcmp.ge.f32.partialorder %v1579_v48, %v1585_v59  ;;  %v1606_v2 = vsel %vm541_vm7, %v1600_v44, -inf }
 0x58a   :  { %1607 = vmax.xlane.f32.xlu0 %v1606_v2  ;;  %v1599_v60 = vsel %vm1595_vm15, -inf, %v1579_v48 }
 0x58b   :  { %v1603_v61 = vsel %vm541_vm7, %v1599_v60, -inf }
 0x58c   :  { %v1591_v16 = vpop.xlane.xlu0 %1590  ;;  %1604 = vmax.xlane.f32.xlu1 %v1603_v61  ;;  %v1444_v15 = vpop.permute.xlu1 %1443 }
 0x58d   :  { %vm1597_vm11 = vcmp.ge.f32.partialorder %v1581_v54, %v1591_v16  ;;  %v1455_v26 = vsel %vm74_vm1, %v1444_v15, 0.0 }
 0x58e   :  { %v1601_v12 = vsel %vm1597_vm11, -inf, %v1581_v54  ;;  %vm2478_vm11 = vcmask 195712  }
 0x58f   :  { %v1609_v14 = vsel %vm541_vm7, %v1601_v12, -inf }
 0x590   :  { %v1594_v62 = vpop.xlane.xlu0 %1593 }
 0x591   :  { %vm1598_vm10 = vcmp.ge.f32.partialorder %v1582_v53, %v1594_v62 }
 0x592   :  { %v1602_v46 = vsel %vm1598_vm10, -inf, %v1582_v53 }
 0x593   :  { %v1612_v10 = vsel %vm541_vm7, %v1602_v46, -inf }
 0x594   :  { %1613 = vmax.xlane.f32.xlu0 %v1612_v10 }
 0x59d   :  { %1447 = vrot.lane.b32.xlu1 %v5230_v23, %s5085_s0 }
 0x5aa   :  { %1445 = vrot.lane.b32.xlu0 %v5224_v21, %s5085_s0 }
 0x5c1   :  { %1610 = vmax.xlane.f32.xlu1 %v1609_v14 }
 0x5c9   :  { %768 = vmax.xlane.f32.xlu0 %v767_v17 }
 0x5cd   :  { %1456 = vadd.xlane.f32.xlu0 %v1455_v26 }
 0x5d2   :  { %1449 = vrot.lane.b32.xlu1 %v5236_v25, %s5085_s0 }
 0x5f6   :  { %762 = vmax.xlane.f32.xlu1 %v761_v9 }
 0x613   :  { %v1608_v28 = vpop.xlane.xlu0 %1607 }
 0x614   :  { %vm1616_vm13 = vcmp.ge.f32.partialorder %v1580_v42, %v1608_v28 }
 0x615   :  { %v1605_v4 = vpop.xlane.xlu1 %1604  ;;  %v1620_v56 = vsel %vm1616_vm13, %v1580_v42, -inf }
 0x616   :  { %vm1615_vm14 = vcmp.ge.f32.partialorder %v1579_v48, %v1605_v4  ;;  %v1626_v3 = vsel %vm541_vm7, %v1620_v56, -inf }
 0x617   :  { %1627 = vmax.xlane.f32.xlu0 %v1626_v3  ;;  %v1619_v63 = vsel %vm1615_vm14, %v1579_v48, -inf }
 0x618   :  { %v1623_v29 = vsel %vm541_vm7, %v1619_v63, -inf }
 0x619   :  { %v1448_v11 = vpop.permute.xlu1 %1447 }
 0x61a   :  { %v1461_v6 = vsel %vm74_vm1, %v1448_v11, 0.0 }
 0x61b   :  { %1624 = vmax.xlane.f32.xlu0 %v1623_v29 }
 0x61d   :  { %v1614_v30 = vpop.xlane.xlu0 %1613 }
 0x61e   :  { %vm1618_vm15 = vcmp.ge.f32.partialorder %v1582_v53, %v1614_v30 }
 0x61f   :  { %v1622_v43 = vsel %vm1618_vm15, %v1582_v53, -inf }
 0x620   :  { %v1632_v41 = vsel %vm541_vm7, %v1622_v43, -inf }
 0x621   :  { %v1446_v31 = vpop.permute.xlu0 %1445 }
 0x622   :  { %v1458_v33 = vsel %vm74_vm1, %v1446_v31, 0.0 }
 0x623   :  { %1459 = vadd.xlane.f32.xlu1 %v1458_v33  ;;  %v1820_v33 = vsel %vm74_vm1, %v5391_v40, -inf }
 0x627   :  { %1462 = vadd.xlane.f32.xlu1 %v1461_v6 }
 0x64a   :  { %v1611_v27 = vpop.xlane.xlu1 %1610 }
 0x64b   :  { %vm1617_vm10 = vcmp.ge.f32.partialorder %v1581_v54, %v1611_v27 }
 0x64c   :  { %v1621_v32 = vsel %vm1617_vm10, %v1581_v54, -inf }
 0x64d   :  { %v1629_v34 = vsel %vm541_vm7, %v1621_v32, -inf }
 0x64e   :  { %1630 = vmax.xlane.f32.xlu0 %v1629_v34  ;;  %v1450_v36 = vpop.permute.xlu1 %1449 }
 0x64f   :  { %v1464_v38 = vsel %vm74_vm1, %v1450_v36, 0.0 }
 0x650   :  { %1465 = vadd.xlane.f32.xlu1 %v1464_v38 }
 0x652   :  { %v769_v39 = vpop.xlane.xlu0 %768  ;;  %1633 = vmax.xlane.f32.xlu0 %v1632_v41 }
 0x653   :  { %v773_v42 = vsub.f32 %v5343_v5, %v769_v39 }
 0x655   :  { %v780_v45 = vmul.f32 1.442695, %v773_v42 }
 0x656   :  { %v5436_v55 = vpop.xlane.xlu0 %1456 }
 0x657   :  { %4848 = vpow2.f32 %v780_v45 }
 0x664   :  { %v5430_v47 = vpop.eup %4848 }
 0x665   :  { %v791_v48 = vsel %vm74_vm1, %v5430_v47, 0.0 }
 0x666   :  { %792 = vadd.xlane.f32.xlu0 %v791_v48 }
 0x67f   :  { %v763_v50 = vpop.xlane.xlu1 %762 }
 0x680   :  { %v771_v51 = vsub.f32 %v5341_v1, %v763_v50 }
 0x682   :  { %v776_v52 = vmul.f32 1.442695, %v771_v51 }
 0x684   :  { %4850 = vpow2.f32 %v776_v52 }
 0x691   :  { %v4851_v53 = vpop.eup %4850 }
 0x692   :  { %v785_v54 = vsel %vm74_vm1, %v4851_v53, 0.0 }
 0x693   :  { %786 = vadd.xlane.f32.xlu1 %v785_v54 }
 0x6a0   :  { %v1628_v5 = vpop.xlane.xlu0 %1627 }
 0x6a4   :  { %1174 = vrot.lane.b32.xlu1 %v5264_v18, %s5085_s0  ;;  %v1625_v58 = vpop.xlane.xlu0 %1624 }
 0x6a5   :  { %v1635_v57 = vmax.f32 %v5436_v55, %v1625_v58 }
 0x6a7   :  { %v1651_v2 = vsub.f32 %v1619_v63, %v1635_v57  ;;  %v1639_v36 = vsub.f32 %v5436_v55, %v1635_v57 }
 0x6a9   :  { %v1655_v61 = vmul.f32 1.442695, %v1651_v2 }
 0x6ac   :  { %v1460_v59 = vpop.xlane.xlu1 %1459 }
 0x6ad   :  { %v1636_v44 = vmax.f32 %v1460_v59, %v1628_v5 }
 0x6af   :  { %v1652_v60 = vsub.f32 %v1620_v56, %v1636_v44 }
 0x6b0   :  { %v5449_v10 = vpop.xlane.xlu1 %1462 }
 0x6b1   :  { %v1657_v1 = vmul.f32 1.442695, %v1652_v60 }
 0x6b3   :  { %4852 = vpow2.f32 %v1657_v1 }
 0x6b4   :  { %4854 = vpow2.f32 %v1655_v61 }
 0x6c0   :  { %v5441_v16 = vpop.eup %4852 }
 0x6c1   :  { %v1666_v62 = vsel %vm541_vm7, %v5441_v16, 0.0  ;;  %v5445_v46 = vpop.eup %4854 }
 0x6c2   :  { %1667 = vadd.xlane.f32.xlu0 %v1666_v62  ;;  %v1663_v18 = vsel %vm541_vm7, %v5445_v46, 0.0 }
 0x6c8   :  { %1664 = vadd.xlane.f32.xlu1 %v1663_v18 }
 0x6d7   :  { %v1631_v12 = vpop.xlane.xlu0 %1630 }
 0x6d8   :  { %v1637_v9 = vmax.f32 %v5449_v10, %v1631_v12 }
 0x6d9   :  { %1330 = vrot.lane.b32.xlu1 %v5273_v22, %s5085_s0  ;;  %v1466_v14 = vpop.xlane.xlu1 %1465 }
 0x6da   :  { %v1653_v4 = vsub.f32 %v1621_v32, %v1637_v9  ;;  %v1814_v32 = vsel %vm74_vm1, %v5389_v13, -inf  ;;  %v1641_v55 = vsub.f32 %v5449_v10, %v1637_v9 }
 0x6db   :  { %v1634_v15 = vpop.xlane.xlu0 %1633 }
 0x6dc   :  { %v1638_v17 = vmax.f32 %v1466_v14, %v1634_v15  ;;  %v1659_v56 = vmul.f32 1.442695, %v1653_v4  ;;  %v1647_v5 = vmul.f32 1.442695, %v1641_v55 }
 0x6de   :  { %v1654_v26 = vsub.f32 %v1622_v43, %v1638_v17  ;;  %v1643_v43 = vmul.f32 1.442695, %v1639_v36  ;;  %v5535_v36 = vld [vmem:[#allocation7] sm:$0xff] }
 0x6e0   :  { %v1661_v28 = vmul.f32 1.442695, %v1654_v26 }
 0x6e2   :  { %4856 = vpow2.f32 %v1661_v28 }
 0x6e3   :  { %4858 = vpow2.f32 %v1659_v56 }
 0x6ef   :  { %v5454_v3 = vpop.eup %4856  ;;  %v793_v30 = vpop.xlane.xlu0 %792 }
 0x6f0   :  { %v1672_v63 = vsel %vm541_vm7, %v5454_v3, 0.0  ;;  %v5458_v29 = vpop.eup %4858 }
 0x6f1   :  { %1673 = vadd.xlane.f32.xlu0 %v1672_v63  ;;  %v1669_v22 = vsel %vm541_vm7, %v5458_v29, 0.0 }
 0x6fd   :  { %1670 = vadd.xlane.f32.xlu1 %v1669_v22 }
 0x707   :  { %1172 = vrot.lane.b32.xlu0 %v5269_v20, %s5085_s0 }
 0x70e   :  { %1328 = vrot.lane.b32.xlu1 %v5279_v24, %s5085_s0 }
 0x71c   :  { %v787_v31 = vpop.xlane.xlu1 %786 }
 0x71d   :  { %4860 = vrcp.f32 %v787_v31 }
 0x71e   :  { %4862 = vrcp.f32 %v793_v30 }
 0x720   :  { %v1175_v24 = vpop.permute.xlu1 %1174 }
 0x726   :  { %1821 = vmax.xlane.f32.xlu0 %v1820_v33 }
 0x72a   :  { %v4861_v11 = vpop.eup %4860 }
 0x72b   :  { %v799_v6 = vmul.f32 %v4861_v11, %v4851_v53  ;;  %v4863_v27 = vpop.eup %4862  ;;  %v1642_v53 = vsub.f32 %v1466_v14, %v1638_v17 }
 0x72c   :  { %v801_v20 = vmul.f32 %v4863_v27, %v5430_v47 }
 0x72d   :  { %4623 = vmatmul.mubr.msk.f32.vlgmr.msra.gmra.mxu1 %vm74_vm1, %v799_v6  ;;  %v1649_v54 = vmul.f32 1.442695, %v1642_v53 }
 0x72e   :  { %4631 = vmatpush3.msra.mxu1 %v5356_v8  ;;  %4632 = vmatprep.mubr.msk.f32.mxu1 %vm5084_vm0, %v5083_v0  ;;  %v1640_v8 = vsub.f32 %v1460_v59, %v1636_v44 }
 0x72f   :  { %4640 = vmatprep.subr.mxu1 %v5083_v0 }
 0x730   :  { %v1645_v34 = vmul.f32 1.442695, %v1640_v8 }
 0x731   :  { %4633 = vmatmul.mubr.msk.f32.vlgmr.msra.gmra.mxu1 %vm74_vm1, %v801_v20 }
 0x732   :  { %4641 = vmatpush3.xpose.msk.msra.mxu1 %vm74_vm1, %v1175_v24  ;;  %1815 = vmax.xlane.f32.xlu1 %v1814_v32  ;;  %4864 = vpow2.f32 %v1645_v34 }
 0x733   :  { %4642 = vmatprep.mubr.msk.f32.mxu1 %vm5084_vm0, %v5083_v0  ;;  %4650 = vmatprep.subr.mxu1 %v5083_v0  ;;  %4866 = vpow2.f32 %v1643_v43  ;;  %v2479_v43 = vsel %vm2478_vm11, %v5535_v36, 0.0 }
 0x73f   :  { %v4865_v38 = vpop.eup %4864 }
 0x740   :  { %v4867_v42 = vpop.eup %4866 }
 0x74b   :  { %v1668_v41 = vpop.xlane.xlu0 %1667 }
 0x74c   :  { %v1676_v39 = vadd.f32 %v4865_v38, %v1668_v41  ;;  %v2480_v41 = vrot.slane %v2479_v43, 4 }
 0x74e   :  { %4868 = vrcp.f32 %v1676_v39  ;;  %v2481_v53 = vadd.f32 %v2480_v41, %v2479_v43 }
 0x751   :  { %v1665_v45 = vpop.xlane.xlu1 %1664 }
 0x752   :  { %v1675_v47 = vadd.f32 %v4867_v42, %v1665_v45 }
 0x754   :  { %4870 = vrcp.f32 %v1675_v47 }
 0x755   :  { %4872 = vpow2.f32 %v1649_v54  ;;  %v1331_v2 = vpop.permute.xlu1 %1330 }
 0x756   :  { %4874 = vpow2.f32 %v1647_v5 }
 0x75b   :  { %v4869_v48 = vpop.eup %4868 }
 0x75c   :  { %v5482_v50 = vmul.f32 %v4869_v48, %v4865_v38  ;;  %v1684_v14 = vmul.f32 %v4869_v48, %v5441_v16  ;;  %v5544_v48 = vld [vmem:[#allocation7 + $0x18] sm:$0xff] }
 0x761   :  { %v4871_v51 = vpop.eup %4870 }
 0x762   :  { %v5484_v52 = vmul.f32 %v4871_v51, %v4867_v42  ;;  %v4873_v58 = vpop.eup %4872  ;;  %v1683_v18 = vmul.f32 %v4871_v51, %v5445_v46  ;;  %v5541_v42 = vld [vmem:[#allocation7 + $0x10] sm:$0xff]  ;;  %v2500_v51 = vsel %vm2478_vm11, %v5544_v48, 0.0 }
 0x763   :  { %v4875_v60 = vpop.eup %4874  ;;  %v2493_v45 = vsel %vm2478_vm11, %v5541_v42, 0.0  ;;  %v2501_v55 = vrot.slane %v2500_v51, 4 }
 0x764   :  { %v2494_v47 = vrot.slane %v2493_v45, 4 }
 0x766   :  { %v2495_v5 = vadd.f32 %v2494_v47, %v2493_v45 }
 0x77a   :  { %v1674_v57 = vpop.xlane.xlu0 %1673 }
 0x77b   :  { %v1678_v59 = vadd.f32 %v4873_v58, %v1674_v57 }
 0x77d   :  { %4876 = vrcp.f32 %v1678_v59  ;;  %v1790_v59 = vmul.f32 %v5535_v36, %v5484_v52 }
 0x77e   :  { %v1173_v44 = vpop.permute.xlu0 %1172 }
 0x77f   :  { %4643 = vmatmul.mubr.msk.f32.vlgmr.msra.gmra.mxu1 %vm74_vm1, %v1173_v44  ;;  %v2502_v44 = vadd.f32 %v2501_v55, %v2500_v51 }
 0x780   :  { %4651 = vmatpush3.xpose.msk.msra.mxu1 %vm74_vm1, %v1331_v2  ;;  %4652 = vmatprep.mubr.msk.f32.mxu1 %vm5084_vm0, %v5083_v0 }
 0x781   :  { %4663 = vmatprep.subr.msk.mxu1 %vm658_vm12, %v5366_v7 }
 0x786   :  { %v1671_v1 = vpop.xlane.xlu1 %1670 }
 0x787   :  { %v1677_v61 = vadd.f32 %v4875_v60, %v1671_v1 }
 0x789   :  { %4878 = vrcp.f32 %v1677_v61 }
 0x78a   :  { %v1329_v62 = vpop.permute.xlu1 %1328  ;;  %v4877_v10 = vpop.eup %4876 }
 0x78b   :  { %4653 = vmatmul.mubr.msk.f32.vlgmr.msra.gmra.mxu1 %vm74_vm1, %v1329_v62  ;;  %v5498_v12 = vmul.f32 %v4877_v10, %v4873_v58  ;;  %v1686_v26 = vmul.f32 %v4877_v10, %v5454_v3  ;;  %v2482_v58 = vrot.slane %v2481_v53, 2 }
 0x78c   :  { %4664 = vmatpush3.msk.msra.mxu1 %vm658_vm12, %v5366_v7  ;;  %4665 = vmatprep.mubr.msk.f32.mxu1 %vm541_vm7, %v1683_v18  ;;  %v2503_v18 = vrot.slane %v2502_v44, 2 }
 0x78d   :  { %4676 = vmatprep.subr.mxu1 %v5083_v0  ;;  %v2483_v61 = vadd.f32 %v2482_v58, %v2481_v53 }
 0x78f   :  { %4666 = vmatmul.mubr.msk.f32.vlgmr.msra.gmra.mxu1 %vm541_vm7, %v1684_v14  ;;  %v2484_v14 = vrot.slane %v2483_v61, 1 }
 0x796   :  { %v4879_v15 = vpop.eup %4878 }
 0x797   :  { %v1685_v17 = vmul.f32 %v4879_v15, %v5458_v29  ;;  %v5504_v46 = vmul.f32 %v4879_v15, %v4875_v60  ;;  %v2496_v60 = vrot.slane %v2495_v5, 2 }
 0x799   :  { %4668 = vmatprep.mubr.msk.f32.mxu1 %vm541_vm7, %v1685_v17  ;;  %v2497_v10 = vadd.f32 %v2496_v60, %v2495_v5  ;;  %v5550_v17 = vld [vmem:[#allocation2] sm:$0xff] }
 0x79a   :  { %4669 = vmatmul.mubr.msk.f32.gmra.mxu1 %vm541_vm7, %v1686_v26  ;;  %v2504_v26 = vadd.f32 %v2503_v18, %v2502_v44 }
 0x79b   :  { %4678 = vmatprep.mubr.msk.f32.mxu1 %vm5084_vm0, %v5083_v0  ;;  %v2498_v52 = vrot.slane %v2497_v10, 1 }
 0x7af   :  { %v1822_v30 = vpop.xlane.xlu0 %1821 }
 0x7b0   :  { %v1828_v31 = vsub.f32 %v5391_v40, %v1822_v30  ;;  %v2505_v30 = vrot.slane %v2504_v26, 1 }
 0x7b2   :  { %v1834_v11 = vmul.f32 1.442695, %v1828_v31 }
 0x7b4   :  { %4880 = vpow2.f32 %v1834_v11  ;;  %v2499_v11 = vadd.f32 %v2498_v52, %v2497_v10 }
 0x7bb   :  { %v1816_v27 = vpop.xlane.xlu1 %1815 }
 0x7bc   :  { %v1826_v20 = vsub.f32 %v5389_v13, %v1816_v27  ;;  %v5538_v13 = vld [vmem:[#allocation7 + $0x8] sm:$0xff] }
 0x7bd   :  { %v2486_v38 = vsel %vm2478_vm11, %v5538_v13, 0.0 }
 0x7be   :  { %v1830_v24 = vmul.f32 1.442695, %v1826_v20  ;;  %v2487_v39 = vrot.slane %v2486_v38, 4  ;;  %v2506_v20 = vadd.f32 %v2505_v30, %v2504_v26 }
 0x7c0   :  { %4882 = vpow2.f32 %v1830_v24  ;;  %v2488_v54 = vadd.f32 %v2487_v39, %v2486_v38  ;;  %v2509_v24 = vmul.f32 0.125, %v2499_v11  ;;  %v5571_v38 = vld [vmem:[#allocation5 + $0x10] sm:$0xff] }
 0x7c1   :  { %v5527_v32 = vpop.eup %4880 }
 0x7c2   :  { %v1844_v8 = vsel %vm74_vm1, %v5527_v32, 0.0  ;;  %v2489_v57 = vrot.slane %v2488_v54, 2 }
 0x7c4   :  { %v2490_v62 = vadd.f32 %v2489_v57, %v2488_v54 }
 0x7c6   :  { %v2491_v15 = vrot.slane %v2490_v62, 1 }
 0x7cd   :  { %v5531_v34 = vpop.eup %4882 }
 0x7ce   :  { %v1838_v40 = vsel %vm74_vm1, %v5531_v34, 0.0 }
 0x7ed   :  { %v5511_v7 = vpop.f32.mrf.mxu1 }
 0x7ef   :  { %v4624_v16 = vpop.f32.mrf.mxu1 }
 0x7f0   :  { %v2485_v16 = vadd.f32 %v2484_v14, %v2483_v61 }
 0x7f1   :  { %v5513_v9 = vpop.f32.mrf.mxu1 }
 0x7f3   :  { %v4634_v28 = vpop.f32.mrf.mxu1 }
 0x7f4   :  { %v2492_v28 = vadd.f32 %v2491_v15, %v2490_v62 }
 0x7f6   :  { %v2508_v27 = vmul.f32 0.125, %v2492_v28 }
 0x83f   :  { %v5515_v4 = vpop.f32.mrf.mxu1 }
 0x841   :  { %v4644_v56 = vpop.f32.mrf.mxu1 }
 0x842   :  { %v1792_v56 = vmul.f32 %v5541_v42, %v5504_v46 }
 0x84b   :  { %v5517_v63 = vpop.f32.mrf.mxu1 }
 0x84d   :  { %v4654_v29 = vpop.f32.mrf.mxu1 }
 0x84f   :  { %v5519_v3 = vpop.f32.mrf.mxu1 }
 0x851   :  { %v1767_v22 = vpop.f32.mrf.mxu1 }
 0x852   :  { %1798 = vrot.lane.b32.xlu0 %v1767_v22, %s5081_s18  ;;  %v5556_v22 = vld [vmem:[#allocation2 + $0x10] sm:$0xff] }
 0x85a   :  { %v5523_v33 = vpop.f32.mrf.mxu1 }
 0x85c   :  { %v1777_v6 = vpop.f32.mrf.mxu1 }
 0x85d   :  { %1802 = vrot.lane.b32.xlu1 %v1777_v6, %s5081_s18  ;;  %v2507_v6 = vmul.f32 0.125, %v2485_v16 }
 0x85f   :  { %v2547_v46 = vsel %vm432_vm2, %v2508_v27, %v2507_v6 }
 0x860   :  { %v2548_v43 = vsel %vm434_vm3, %v2509_v24, %v2547_v46 }
 0x871   :  { %1845 = vadd.xlane.f32.xlu0 %v1844_v8  ;;  %v5564_v8 = vld [vmem:[#allocation5] sm:$0xff] }
 0x881   :  { %1839 = vadd.xlane.f32.xlu1 %v1838_v40  ;;  %v2510_v40 = vmul.f32 0.125, %v2506_v20 }
 0x883   :  { %v2549_v41 = vsel %vm436_vm4, %v2510_v40, %v2548_v43 }
 0x8c4   :  { %v1799_v2 = vpop.permute.xlu0 %1798 }
 0x8c5   :  { %v1810_v1 = vadd.f32 %v1799_v2, %v1790_v59 }
 0x8c7   :  { %1859 = vrot.lane.b32.xlu0 %v1810_v1, %s5085_s0 }
 0x8cb   :  { %2166 = vrot.lane.b32.xlu0 %v5550_v17, %s5086_s2 }
 0x8cf   :  { %v1803_v29 = vpop.permute.xlu1 %1802  ;;  %2322 = vrot.lane.b32.xlu0 %v5556_v22, %s5086_s2 }
 0x8d0   :  { %v1812_v31 = vadd.f32 %v1803_v29, %v1792_v56 }
 0x8d2   :  { %2013 = vrot.lane.b32.xlu1 %v1812_v31, %s5085_s0 }
 0x8d3   :  { %2535 = vrot.lane.b32.xlu0 %v5535_v36, %s5086_s2 }
 0x8d6   :  { %2168 = vrot.lane.b32.xlu1 %v5564_v8, %s5086_s2 }
 0x8d7   :  { %2539 = vrot.lane.b32.xlu0 %v5541_v42, %s5086_s2 }
 0x8da   :  { %2324 = vrot.lane.b32.xlu1 %v5571_v38, %s5086_s2 }
 0x8de   :  { %2550 = vrot.lane.b32.xlu1 %v2549_v41, %s5086_s2 }
 0x8e2   :  { %2537 = vrot.lane.b32.xlu1 %v5538_v13, %s5086_s2 }
 0x8e6   :  { %2541 = vrot.lane.b32.xlu1 %v5544_v48, %s5086_s2 }
 0x8fa   :  { %v1846_v45 = vpop.xlane.xlu0 %1845 }
 0x90a   :  { %v1840_v39 = vpop.xlane.xlu1 %1839 }
 0x90b   :  { %4884 = vrcp.f32 %v1840_v39 }
 0x90c   :  { %4886 = vrcp.f32 %v1846_v45 }
 0x918   :  { %v4885_v47 = vpop.eup %4884 }
 0x919   :  { %v1854_v51 = vmul.f32 %v4885_v47, %v5531_v34  ;;  %v4887_v54 = vpop.eup %4886 }
 0x91a   :  { %v1856_v58 = vmul.f32 %v4887_v54, %v5527_v32 }
 0x939   :  { %v1860_v53 = vpop.permute.xlu0 %1859 }
 0x93a   :  { %4672 = vmatpush3.msra.mxu0 %v1860_v53 }
 0x93b   :  { %4674 = vmatmul.mubr.msk.f32.vlgmr.msra.gmra.mxu0 %vm74_vm1, %v1854_v51  ;;  %4681 = vmatprep.subr.mxu0 %v5083_v0 }
 0x93c   :  { %4683 = vmatprep.mubr.msk.f32.mxu0 %vm5084_vm0, %v5083_v0 }
 0x93d   :  { %v2167_v55 = vpop.permute.xlu0 %2166 }
 0x941   :  { %v2323_v34 = vpop.permute.xlu0 %2322 }
 0x944   :  { %v2014_v5 = vpop.permute.xlu1 %2013 }
 0x945   :  { %4682 = vmatpush3.msra.mxu0 %v2014_v5  ;;  %v2536_v32 = vpop.permute.xlu0 %2535 }
 0x946   :  { %4684 = vmatmul.mubr.msk.f32.vlgmr.msra.gmra.mxu0 %vm74_vm1, %v1856_v58  ;;  %4691 = vmatprep.subr.mxu0 %v5083_v0 }
 0x947   :  { %4693 = vmatprep.mubr.msk.f32.mxu0 %vm5084_vm0, %v5083_v0 }
 0x948   :  { %v2169_v57 = vpop.permute.xlu1 %2168 }
 0x949   :  { %4692 = vmatpush3.xpose.msk.msra.mxu0 %vm74_vm1, %v2169_v57  ;;  %v2540_v2 = vpop.permute.xlu0 %2539  ;;  %v1823_v57 = vsel %vm74_vm1, %v5517_v63, -inf }
 0x94a   :  { %4701 = vmatprep.subr.mxu0 %v5083_v0 }
 0x94c   :  { %4694 = vmatmul.mubr.msk.f32.vlgmr.msra.gmra.mxu0 %vm74_vm1, %v2167_v55  ;;  %v2325_v59 = vpop.permute.xlu1 %2324 }
 0x94d   :  { %4702 = vmatpush3.xpose.msk.msra.mxu0 %vm74_vm1, %v2325_v59  ;;  %4703 = vmatprep.mubr.msk.f32.mxu0 %vm5084_vm0, %v5083_v0 }
 0x950   :  { %4704 = vmatmul.mubr.msk.f32.vlgmr.msra.gmra.mxu0 %vm74_vm1, %v2323_v34  ;;  %v5598_v44 = vpop.permute.xlu1 %2550  ;;  %v1817_v34 = vsel %vm74_vm1, %v5515_v4, -inf }
 0x951   :  { %4711 = vmatprep.subr.msk.mxu0 %vm74_vm1, %v5598_v44  ;;  %4713 = vmatprep.mubr.msk.f32.mxu0 %vm74_vm1, %v2536_v32 }
 0x952   :  { %4712 = vmatpush3.xpose.msk.msra.mxu0 %vm74_vm1, %v5598_v44 }
 0x953   :  { %4727 = vmatprep.subr.mxu0 %v5083_v0 }
 0x954   :  { %v2538_v60 = vpop.permute.xlu1 %2537 }
 0x955   :  { %4714 = vmatmul.mubr.msk.f32.vlgmr.msra.gmra.mxu0 %vm74_vm1, %v2538_v60 }
 0x956   :  { %4716 = vmatprep.mubr.msk.f32.mxu0 %vm74_vm1, %v2540_v2 }
 0x958   :  { %v2542_v1 = vpop.permute.xlu1 %2541 }
 0x959   :  { %4717 = vmatmul.mubr.msk.f32.gmra.mxu0 %vm74_vm1, %v2542_v1 }
 0x95a   :  { %4729 = vmatprep.mubr.msk.f32.mxu0 %vm5084_vm0, %v5083_v0 }
 0x9fb   :  { %v5611_v61 = vpop.f32.mrf.mxu0 }
 0x9fd   :  { %v4675_v62 = vpop.f32.mrf.mxu0 }
 0xa06   :  { %v5613_v18 = vpop.f32.mrf.mxu0 }
 0xa08   :  { %v4685_v10 = vpop.f32.mrf.mxu0 }
 0xa0c   :  { %v5615_v14 = vpop.f32.mrf.mxu0 }
 0xa0e   :  { %v4695_v15 = vpop.f32.mrf.mxu0 }
 0xa10   :  { %v5617_v26 = vpop.f32.mrf.mxu0 }
 0xa12   :  { %v4705_v52 = vpop.f32.mrf.mxu0 }
 0xa15   :  { %v4715_v16 = vpop.f32.mrf.mxu0 }
 0xa16   :  { %v2648_v28 = vsel %vm71_vm6, -inf, %v4715_v16 }
 0xa17   :  { %v2628_v56 = vpop.f32.mrf.mxu0  ;;  %v2654_v29 = vsel %vm541_vm7, %v2648_v28, -inf }
 0xa18   :  { %v5624_v30 = vsel %vm70_vm5, -inf, %v2628_v56  ;;  %2655 = vmax.xlane.f32.xlu1 %v2654_v29 }
 0xa19   :  { %v4718_v31 = vpop.f32.mrf.mxu0  ;;  %v2651_v11 = vsel %vm541_vm7, %v5624_v30, -inf }
 0xa1a   :  { %2652 = vmax.xlane.f32.xlu0 %v2651_v11  ;;  %v2650_v24 = vsel %vm73_vm8, -inf, %v4718_v31 }
 0xa1b   :  { %v2638_v6 = vpop.f32.mrf.mxu0  ;;  %v2660_v46 = vsel %vm541_vm7, %v2650_v24, -inf }
 0xa1c   :  { %v2649_v27 = vsel %vm72_vm9, -inf, %v2638_v6 }
 0xa1d   :  { %v2657_v20 = vsel %vm541_vm7, %v2649_v27, -inf }
 0xa1e   :  { %2658 = vmax.xlane.f32.xlu0 %v2657_v20 }
 0xa22   :  { %2661 = vmax.xlane.f32.xlu0 %v2660_v46 }
 0xaa1   :  { %v2656_v40 = vpop.xlane.xlu1 %2655 }
 0xaa2   :  { %vm2664_vm13 = vcmp.ge.f32.partialorder %v2648_v28, %v2656_v40 }
 0xaa3   :  { %v2653_v43 = vpop.xlane.xlu0 %2652  ;;  %v2668_v41 = vsel %vm2664_vm13, -inf, %v2648_v28 }
 0xaa4   :  { %vm2663_vm14 = vcmp.ge.f32.partialorder %v5624_v30, %v2653_v43  ;;  %v2674_v39 = vsel %vm541_vm7, %v2668_v41, -inf }
 0xaa5   :  { %2675 = vmax.xlane.f32.xlu1 %v2674_v39  ;;  %v2667_v45 = vsel %vm2663_vm14, -inf, %v5624_v30 }
 0xaa6   :  { %v2671_v47 = vsel %vm541_vm7, %v2667_v45, -inf }
 0xaa7   :  { %2672 = vmax.xlane.f32.xlu0 %v2671_v47  ;;  %v2659_v51 = vpop.xlane.xlu0 %2658 }
 0xaa8   :  { %vm2665_vm15 = vcmp.ge.f32.partialorder %v2649_v27, %v2659_v51 }
 0xaa9   :  { %v2669_v53 = vsel %vm2665_vm15, -inf, %v2649_v27 }
 0xaaa   :  { %v2677_v54 = vsel %vm541_vm7, %v2669_v53, -inf }
 0xaab   :  { %2678 = vmax.xlane.f32.xlu0 %v2677_v54  ;;  %v2662_v55 = vpop.xlane.xlu0 %2661 }
 0xaac   :  { %vm2666_vm10 = vcmp.ge.f32.partialorder %v2650_v24, %v2662_v55 }
 0xaad   :  { %v2670_v5 = vsel %vm2666_vm10, -inf, %v2650_v24  ;;  %vm3546_vm10 = vcmask 261312  }
 0xaae   :  { %v2680_v58 = vsel %vm541_vm7, %v2670_v5, -inf }
 0xaaf   :  { %2681 = vmax.xlane.f32.xlu1 %v2680_v58  ;;  %v1793_v58 = vmul.f32 %v5544_v48, %v5498_v12  ;;  %v1791_v12 = vmul.f32 %v5538_v13, %v5482_v50 }
 0xac0   :  { %2513 = vrot.lane.b32.xlu1 %v5224_v21, %s5086_s2 }
 0xac1   :  { %2511 = vrot.lane.b32.xlu0 %v5218_v19, %s5086_s2 }
 0xac4   :  { %2515 = vrot.lane.b32.xlu1 %v5230_v23, %s5086_s2 }
 0xac8   :  { %2517 = vrot.lane.b32.xlu1 %v5236_v25, %s5086_s2 }
 0xae0   :  { %1818 = vmax.xlane.f32.xlu0 %v1817_v34 }
 0xaec   :  { %1824 = vmax.xlane.f32.xlu1 %v1823_v57 }
 0xb2e   :  { %v2676_v59 = vpop.xlane.xlu1 %2675 }
 0xb2f   :  { %vm2684_vm11 = vcmp.ge.f32.partialorder %v2648_v28, %v2676_v59 }
 0xb30   :  { %v2673_v32 = vpop.xlane.xlu0 %2672  ;;  %v5652_v2 = vsel %vm2684_vm11, %v2648_v28, -inf }
 0xb31   :  { %v2694_v60 = vsel %vm541_vm7, %v5652_v2, -inf  ;;  %vm2683_vm15 = vcmp.ge.f32.partialorder %v5624_v30, %v2673_v32 }
 0xb32   :  { %2695 = vmax.xlane.f32.xlu1 %v2694_v60  ;;  %v2687_v46 = vsel %vm2683_vm15, %v5624_v30, -inf }
 0xb34   :  { %v2679_v1 = vpop.xlane.xlu0 %2678 }
 0xb35   :  { %vm2685_vm13 = vcmp.ge.f32.partialorder %v2649_v27, %v2679_v1 }
 0xb36   :  { %v2689_v56 = vsel %vm2685_vm13, %v2649_v27, -inf  ;;  %v2691_v27 = vsel %vm541_vm7, %v2687_v46, -inf }
 0xb37   :  { %v2697_v31 = vsel %vm541_vm7, %v2689_v56, -inf }
 0xb38   :  { %v2512_v62 = vpop.permute.xlu0 %2511  ;;  %v2682_v10 = vpop.xlane.xlu1 %2681 }
 0xb39   :  { %vm2686_vm14 = vcmp.ge.f32.partialorder %v2650_v24, %v2682_v10  ;;  %v2523_v15 = vsel %vm74_vm1, %v2512_v62, 0.0  ;;  %v5698_v62 = vld [vmem:[#allocation5 + $0x8] sm:$0xff] }
 0xb3a   :  { %2524 = vadd.xlane.f32.xlu0 %v2523_v15  ;;  %v5657_v52 = vsel %vm2686_vm14, %v2650_v24, -inf }
 0xb3b   :  { %v2700_v16 = vsel %vm541_vm7, %v5657_v52, -inf }
 0xb3c   :  { %2701 = vmax.xlane.f32.xlu1 %v2700_v16  ;;  %v2514_v28 = vpop.permute.xlu1 %2513  ;;  %v5704_v16 = vld [vmem:[#allocation2 + $0x8] sm:$0xff] }
 0xb3d   :  { %v2526_v29 = vsel %vm74_vm1, %v2514_v28, 0.0 }
 0xb3e   :  { %2527 = vadd.xlane.f32.xlu0 %v2526_v29 }
 0xb40   :  { %2698 = vmax.xlane.f32.xlu1 %v2697_v31  ;;  %v2516_v11 = vpop.permute.xlu1 %2515 }
 0xb41   :  { %v2529_v6 = vsel %vm74_vm1, %v2516_v11, 0.0 }
 0xb42   :  { %2530 = vadd.xlane.f32.xlu0 %v2529_v6 }
 0xb44   :  { %v2518_v20 = vpop.permute.xlu1 %2517 }
 0xb45   :  { %v2532_v24 = vsel %vm74_vm1, %v2518_v20, 0.0 }
 0xb46   :  { %2533 = vadd.xlane.f32.xlu0 %v2532_v24 }
 0xb4a   :  { %2692 = vmax.xlane.f32.xlu0 %v2691_v27 }
 0xb51   :  { %1804 = vrot.lane.b32.xlu1 %v5523_v33, %s5081_s18 }
 0xb60   :  { %1800 = vrot.lane.b32.xlu0 %v5519_v3, %s5081_s18 }
 0xb69   :  { %v1819_v40 = vpop.xlane.xlu0 %1818 }
 0xb6a   :  { %v1827_v43 = vsub.f32 %v5515_v4, %v1819_v40 }
 0xb6c   :  { %v1832_v41 = vmul.f32 1.442695, %v1827_v43 }
 0xb6e   :  { %4888 = vpow2.f32 %v1832_v41 }
 0xb75   :  { %v1825_v39 = vpop.xlane.xlu1 %1824 }
 0xb76   :  { %v1829_v45 = vsub.f32 %v5517_v63, %v1825_v39 }
 0xb78   :  { %v1836_v47 = vmul.f32 1.442695, %v1829_v45 }
 0xb7a   :  { %4890 = vpow2.f32 %v1836_v47 }
 0xb7b   :  { %v5674_v30 = vpop.eup %4888 }
 0xb7c   :  { %v1841_v51 = vsel %vm74_vm1, %v5674_v30, 0.0 }
 0xb7d   :  { %1842 = vadd.xlane.f32.xlu1 %v1841_v51  ;;  %v5731_v51 = vld [vmem:[#allocation2 + $0x18] sm:$0xff] }
 0xb87   :  { %v5678_v33 = vpop.eup %4890 }
 0xb88   :  { %v1847_v3 = vsel %vm74_vm1, %v5678_v33, 0.0 }
 0xb89   :  { %1848 = vadd.xlane.f32.xlu0 %v1847_v3  ;;  %v5735_v3 = vld [vmem:[#allocation5 + $0x18] sm:$0xff] }
 0xbbb   :  { %v2696_v4 = vpop.xlane.xlu1 %2695 }
 0xbc3   :  { %v5682_v53 = vpop.xlane.xlu0 %2524 }
 0xbc5   :  { %v2702_v54 = vpop.xlane.xlu1 %2701 }
 0xbc7   :  { %v5684_v55 = vpop.xlane.xlu0 %2527 }
 0xbc8   :  { %v2704_v29 = vmax.f32 %v5684_v55, %v2696_v4  ;;  %v2882_v4 = vsel %vm74_vm1, %v5615_v14, -inf }
 0xbc9   :  { %v2699_v63 = vpop.xlane.xlu1 %2698 }
 0xbca   :  { %v2720_v6 = vsub.f32 %v5652_v2, %v2704_v29 }
 0xbcb   :  { %v5686_v5 = vpop.xlane.xlu0 %2530 }
 0xbcc   :  { %v2705_v31 = vmax.f32 %v5686_v5, %v2699_v63  ;;  %v2725_v24 = vmul.f32 1.442695, %v2720_v6 }
 0xbcd   :  { %v1805_v34 = vpop.permute.xlu1 %1804 }
 0xbce   :  { %v1813_v57 = vadd.f32 %v1805_v34, %v1793_v58  ;;  %v2721_v20 = vsub.f32 %v2689_v56, %v2705_v31 }
 0xbcf   :  { %v5690_v59 = vpop.xlane.xlu0 %2533 }
 0xbd0   :  { %v5693_v32 = vmax.f32 %v5690_v59, %v2702_v54  ;;  %2090 = vrot.lane.b32.xlu1 %v1813_v57, %s5085_s0  ;;  %v2727_v40 = vmul.f32 1.442695, %v2721_v20  ;;  %v2888_v54 = vsel %vm74_vm1, %v5617_v26, -inf  ;;  %v2708_v20 = vsub.f32 %v5684_v55, %v2704_v29 }
 0xbd2   :  { %v2710_v60 = vsub.f32 %v5690_v59, %v5693_v32  ;;  %v2722_v27 = vsub.f32 %v5657_v52, %v5693_v32 }
 0xbd3   :  { %v2693_v1 = vpop.xlane.xlu0 %2692 }
 0xbd4   :  { %2246 = vrot.lane.b32.xlu1 %v5698_v62, %s5086_s2  ;;  %v2703_v28 = vmax.f32 %v5682_v53, %v2693_v1  ;;  %v2729_v43 = vmul.f32 1.442695, %v2722_v27 }
 0xbd6   :  { %v2719_v11 = vsub.f32 %v2687_v46, %v2703_v28  ;;  %v2707_v6 = vsub.f32 %v5682_v53, %v2703_v28 }
 0xbd7   :  { %v1801_v10 = vpop.permute.xlu0 %1800 }
 0xbd8   :  { %v1811_v15 = vadd.f32 %v1801_v10, %v1791_v12  ;;  %2244 = vrot.lane.b32.xlu1 %v5704_v16, %s5086_s2  ;;  %v2723_v50 = vmul.f32 1.442695, %v2719_v11 }
 0xbda   :  { %1936 = vrot.lane.b32.xlu0 %v1811_v15, %s5085_s0  ;;  %4892 = vpow2.f32 %v2723_v50  ;;  %v2711_v50 = vmul.f32 1.442695, %v2707_v6 }
 0xbdb   :  { %4894 = vpow2.f32 %v2725_v24  ;;  %v2713_v24 = vmul.f32 1.442695, %v2708_v20 }
 0xbdc   :  { %4896 = vpow2.f32 %v2727_v40  ;;  %v2717_v40 = vmul.f32 1.442695, %v2710_v60 }
 0xbdd   :  { %4898 = vpow2.f32 %v2729_v43 }
 0xbe7   :  { %v5715_v41 = vpop.eup %4892 }
 0xbe8   :  { %v5717_v39 = vpop.eup %4894  ;;  %v2731_v46 = vsel %vm541_vm7, %v5715_v41, 0.0 }
 0xbe9   :  { %v5721_v2 = vpop.eup %4896  ;;  %v2734_v56 = vsel %vm541_vm7, %v5717_v39, 0.0 }
 0xbea   :  { %v5725_v52 = vpop.eup %4898  ;;  %v2737_v45 = vsel %vm541_vm7, %v5721_v2, 0.0 }
 0xbeb   :  { %v2740_v47 = vsel %vm541_vm7, %v5725_v52, 0.0 }
 0xbf9   :  { %2732 = vadd.xlane.f32.xlu0 %v2731_v46 }
 0xbfc   :  { %2735 = vadd.xlane.f32.xlu1 %v2734_v56 }
 0xbfd   :  { %2738 = vadd.xlane.f32.xlu0 %v2737_v45 }
 0xc00   :  { %2741 = vadd.xlane.f32.xlu1 %v2740_v47 }
 0xc06   :  { %v1843_v63 = vpop.xlane.xlu1 %1842 }
 0xc07   :  { %4900 = vrcp.f32 %v1843_v63 }
 0xc11   :  { %2400 = vrot.lane.b32.xlu1 %v5731_v51, %s5086_s2 }
 0xc12   :  { %v1849_v58 = vpop.xlane.xlu0 %1848 }
 0xc13   :  { %2402 = vrot.lane.b32.xlu0 %v5735_v3, %s5086_s2  ;;  %4902 = vrcp.f32 %v1849_v58 }
 0xc14   :  { %v4901_v34 = vpop.eup %4900  ;;  %4904 = vpow2.f32 %v2711_v50 }
 0xc15   :  { %v1855_v1 = vmul.f32 %v4901_v34, %v5674_v30  ;;  %4906 = vpow2.f32 %v2713_v24 }
 0xc20   :  { %v4903_v10 = vpop.eup %4902 }
 0xc21   :  { %v1857_v11 = vmul.f32 %v4903_v10, %v5678_v33  ;;  %v2709_v33 = vsub.f32 %v5686_v5, %v2705_v31  ;;  %v4905_v43 = vpop.eup %4904 }
 0xc22   :  { %v4907_v45 = vpop.eup %4906 }
 0xc23   :  { %v2715_v27 = vmul.f32 1.442695, %v2709_v33 }
 0xc25   :  { %4908 = vpow2.f32 %v2715_v27 }
 0xc26   :  { %4910 = vpow2.f32 %v2717_v40 }
 0xc32   :  { %2883 = vmax.xlane.f32.xlu0 %v2882_v4  ;;  %v4909_v55 = vpop.eup %4908 }
 0xc33   :  { %v4911_v31 = vpop.eup %4910 }
 0xc35   :  { %2889 = vmax.xlane.f32.xlu1 %v2888_v54 }
 0xc42   :  { %v2091_v57 = vpop.permute.xlu1 %2090 }
 0xc46   :  { %v2247_v15 = vpop.permute.xlu1 %2246 }
 0xc4a   :  { %v2245_v30 = vpop.permute.xlu1 %2244 }
 0xc4c   :  { %v1937_v12 = vpop.permute.xlu0 %1936 }
 0xc4d   :  { %4677 = vmatpush3.msra.mxu1 %v1937_v12 }
 0xc4e   :  { %4679 = vmatmul.mubr.msk.f32.vlgmr.msra.gmra.mxu1 %vm74_vm1, %v1855_v1  ;;  %4686 = vmatprep.subr.mxu1 %v5083_v0 }
 0xc4f   :  { %4687 = vmatpush3.msra.mxu1 %v2091_v57  ;;  %4688 = vmatprep.mubr.msk.f32.mxu1 %vm5084_vm0, %v5083_v0 }
 0xc50   :  { %4696 = vmatprep.subr.mxu1 %v5083_v0 }
 0xc52   :  { %4689 = vmatmul.mubr.msk.f32.vlgmr.msra.gmra.mxu1 %vm74_vm1, %v1857_v11 }
 0xc53   :  { %4697 = vmatpush3.xpose.msk.msra.mxu1 %vm74_vm1, %v2247_v15  ;;  %4698 = vmatprep.mubr.msk.f32.mxu1 %vm5084_vm0, %v5083_v0 }
 0xc54   :  { %4706 = vmatprep.subr.mxu1 %v5083_v0 }
 0xc56   :  { %4699 = vmatmul.mubr.msk.f32.vlgmr.msra.gmra.mxu1 %vm74_vm1, %v2245_v30 }
 0xc57   :  { %4708 = vmatprep.mubr.msk.f32.mxu1 %vm5084_vm0, %v5083_v0 }
 0xc82   :  { %v2733_v46 = vpop.xlane.xlu0 %2732 }
 0xc83   :  { %v2743_v56 = vadd.f32 %v4905_v43, %v2733_v46 }
 0xc85   :  { %4912 = vrcp.f32 %v2743_v56  ;;  %v2736_v53 = vpop.xlane.xlu1 %2735 }
 0xc86   :  { %v2744_v28 = vadd.f32 %v4907_v45, %v2736_v53  ;;  %v2739_v5 = vpop.xlane.xlu0 %2738 }
 0xc87   :  { %v2745_v29 = vadd.f32 %v4909_v55, %v2739_v5 }
 0xc88   :  { %4914 = vrcp.f32 %v2744_v28 }
 0xc89   :  { %4916 = vrcp.f32 %v2745_v29  ;;  %v2742_v47 = vpop.xlane.xlu1 %2741 }
 0xc8a   :  { %v2746_v4 = vadd.f32 %v4911_v31, %v2742_v47  ;;  %v2403_v54 = vpop.permute.xlu0 %2402  ;;  %v3554_v47 = vsel %vm3546_vm10, %v5538_v13, 0.0 }
 0xc8b   :  { %4707 = vmatpush3.xpose.msk.msra.mxu1 %vm74_vm1, %v2403_v54  ;;  %v3561_v54 = vsel %vm3546_vm10, %v5541_v42, 0.0 }
 0xc8c   :  { %4918 = vrcp.f32 %v2746_v4  ;;  %4719 = vmatprep.subr.msk.mxu1 %vm658_vm12, %v5598_v44  ;;  %v3555_v4 = vrot.slane %v3554_v47, 4 }
 0xc8d   :  { %v2401_v59 = vpop.permute.xlu1 %2400 }
 0xc8e   :  { %4709 = vmatmul.mubr.msk.f32.vlgmr.msra.gmra.mxu1 %vm74_vm1, %v2401_v59  ;;  %v3562_v59 = vrot.slane %v3561_v54, 4 }
 0xc8f   :  { %4720 = vmatpush3.msk.msra.mxu1 %vm658_vm12, %v5598_v44 }
 0xc90   :  { %4732 = vmatprep.subr.mxu1 %v5083_v0 }
 0xc92   :  { %v4913_v32 = vpop.eup %4912 }
 0xc93   :  { %v2751_v60 = vmul.f32 %v4913_v32, %v5715_v41  ;;  %v5772_v63 = vmul.f32 %v4913_v32, %v4905_v43  ;;  %v3568_v32 = vsel %vm3546_vm10, %v5544_v48, 0.0 }
 0xc95   :  { %v4915_v58 = vpop.eup %4914  ;;  %4721 = vmatprep.mubr.msk.f32.mxu1 %vm541_vm7, %v2751_v60 }
 0xc96   :  { %v4917_v34 = vpop.eup %4916  ;;  %v2752_v57 = vmul.f32 %v4915_v58, %v5717_v39  ;;  %v5776_v1 = vmul.f32 %v4915_v58, %v4907_v45  ;;  %v3556_v58 = vadd.f32 %v3555_v4, %v3554_v47 }
 0xc97   :  { %v2753_v12 = vmul.f32 %v4917_v34, %v5721_v2  ;;  %v5779_v10 = vmul.f32 %v4917_v34, %v4909_v55  ;;  %v3569_v34 = vrot.slane %v3568_v32, 4 }
 0xc98   :  { %4722 = vmatmul.mubr.msk.f32.vlgmr.msra.gmra.mxu1 %vm541_vm7, %v2752_v57  ;;  %v3563_v57 = vadd.f32 %v3562_v59, %v3561_v54 }
 0xc99   :  { %v4919_v44 = vpop.eup %4918  ;;  %4724 = vmatprep.mubr.msk.f32.mxu1 %vm541_vm7, %v2753_v12  ;;  %v2860_v54 = vmul.f32 %v5541_v42, %v5779_v10 }
 0xc9a   :  { %v2754_v41 = vmul.f32 %v4919_v44, %v5725_v52  ;;  %v5784_v15 = vmul.f32 %v4919_v44, %v4911_v31  ;;  %v3557_v44 = vrot.slane %v3556_v58, 2 }
 0xc9c   :  { %4725 = vmatmul.mubr.msk.f32.gmra.mxu1 %vm541_vm7, %v2754_v41  ;;  %v3570_v41 = vadd.f32 %v3569_v34, %v3568_v32 }
 0xc9d   :  { %4734 = vmatprep.mubr.msk.f32.mxu1 %vm5084_vm0, %v5083_v0 }
 0xcbb   :  { %v2884_v40 = vpop.xlane.xlu0 %2883 }
 0xcbc   :  { %v2894_v46 = vsub.f32 %v5615_v14, %v2884_v40  ;;  %v3547_v14 = vsel %vm3546_vm10, %v5535_v36, 0.0 }
 0xcbe   :  { %v2898_v56 = vmul.f32 1.442695, %v2894_v46  ;;  %v2890_v45 = vpop.xlane.xlu1 %2889 }
 0xcbf   :  { %v2896_v53 = vsub.f32 %v5617_v26, %v2890_v45  ;;  %v3548_v26 = vrot.slane %v3547_v14, 4 }
 0xcc0   :  { %4920 = vpow2.f32 %v2898_v56 }
 0xcc1   :  { %v2902_v55 = vmul.f32 1.442695, %v2896_v53  ;;  %v3549_v60 = vadd.f32 %v3548_v26, %v3547_v14 }
 0xcc3   :  { %4922 = vpow2.f32 %v2902_v55  ;;  %v3550_v12 = vrot.slane %v3549_v60, 2  ;;  %v2858_v55 = vmul.f32 %v5535_v36, %v5772_v63 }
 0xccd   :  { %v5805_v28 = vpop.eup %4920 }
 0xcce   :  { %v2906_v5 = vsel %vm74_vm1, %v5805_v28, 0.0 }
 0xcd0   :  { %v5809_v29 = vpop.eup %4922 }
 0xcd1   :  { %v2912_v31 = vsel %vm74_vm1, %v5809_v29, 0.0 }
 0xd0e   :  { %v5789_v39 = vpop.f32.mrf.mxu1 }
 0xd10   :  { %v4680_v11 = vpop.f32.mrf.mxu1 }
 0xd11   :  { %v3564_v11 = vrot.slane %v3563_v57, 2 }
 0xd12   :  { %v5791_v2 = vpop.f32.mrf.mxu1 }
 0xd14   :  { %v4690_v30 = vpop.f32.mrf.mxu1 }
 0xd15   :  { %v3551_v30 = vadd.f32 %v3550_v12, %v3549_v60 }
 0xd16   :  { %v5793_v6 = vpop.f32.mrf.mxu1 }
 0xd17   :  { %v3552_v40 = vrot.slane %v3551_v30, 1 }
 0xd18   :  { %v4700_v20 = vpop.f32.mrf.mxu1 }
 0xd19   :  { %v3558_v20 = vadd.f32 %v3557_v44, %v3556_v58  ;;  %v3553_v45 = vadd.f32 %v3552_v40, %v3551_v30 }
 0xd1b   :  { %v3575_v26 = vmul.f32 0.125, %v3553_v45 }
 0xd4e   :  { %v5795_v33 = vpop.f32.mrf.mxu1 }
 0xd50   :  { %v4710_v50 = vpop.f32.mrf.mxu1 }
 0xd51   :  { %v3571_v50 = vrot.slane %v3570_v41, 2 }
 0xd53   :  { %v3572_v46 = vadd.f32 %v3571_v50, %v3570_v41 }
 0xd58   :  { %v5797_v52 = vpop.f32.mrf.mxu1 }
 0xd5a   :  { %v2835_v24 = vpop.f32.mrf.mxu1 }
 0xd5b   :  { %2866 = vrot.lane.b32.xlu0 %v2835_v24, %s5087_s28  ;;  %v3565_v24 = vadd.f32 %v3564_v11, %v3563_v57 }
 0xd5c   :  { %v5800_v27 = vpop.f32.mrf.mxu1 }
 0xd5d   :  { %v3566_v56 = vrot.slane %v3565_v24, 1 }
 0xd5e   :  { %v2845_v43 = vpop.f32.mrf.mxu1 }
 0xd5f   :  { %2870 = vrot.lane.b32.xlu1 %v2845_v43, %s5087_s28  ;;  %v3559_v43 = vrot.slane %v3558_v20, 1  ;;  %v3567_v47 = vadd.f32 %v3566_v56, %v3565_v24 }
 0xd61   :  { %v3560_v53 = vadd.f32 %v3559_v43, %v3558_v20  ;;  %v3577_v58 = vmul.f32 0.125, %v3567_v47 }
 0xd63   :  { %v3576_v4 = vmul.f32 0.125, %v3560_v53 }
 0xd65   :  { %v3615_v34 = vsel %vm432_vm2, %v3576_v4, %v3575_v26 }
 0xd66   :  { %v3616_v57 = vsel %vm434_vm3, %v3577_v58, %v3615_v34 }
 0xd7a   :  { %2907 = vadd.xlane.f32.xlu0 %v2906_v5 }
 0xd83   :  { %2913 = vadd.xlane.f32.xlu1 %v2912_v31  ;;  %v3573_v31 = vrot.slane %v3572_v46, 1 }
 0xd85   :  { %v3574_v32 = vadd.f32 %v3573_v31, %v3572_v46 }
 0xd87   :  { %v3578_v63 = vmul.f32 0.125, %v3574_v32 }
 0xd89   :  { %v3617_v10 = vsel %vm436_vm4, %v3578_v63, %v3616_v57 }
 0xdcd   :  { %v2867_v5 = vpop.permute.xlu0 %2866 }
 0xdce   :  { %v2878_v14 = vadd.f32 %v2867_v5, %v2858_v55 }
 0xdd0   :  { %2927 = vrot.lane.b32.xlu0 %v2878_v14, %s5086_s2 }
 0xdd1   :  { %v2871_v59 = vpop.permute.xlu1 %2870 }
 0xdd2   :  { %v2880_v60 = vadd.f32 %v2871_v59, %v2860_v54 }
 0xdd4   :  { %3081 = vrot.lane.b32.xlu1 %v2880_v60, %s5086_s2  ;;  %3236 = vrot.lane.b32.xlu0 %v5564_v8, %s5088_s29  ;;  %v2885_v60 = vsel %vm74_vm1, %v5793_v6, -inf }
 0xdd8   :  { %3234 = vrot.lane.b32.xlu1 %v5550_v17, %s5088_s29  ;;  %3392 = vrot.lane.b32.xlu0 %v5571_v38, %s5088_s29 }
 0xddc   :  { %3390 = vrot.lane.b32.xlu1 %v5556_v22, %s5088_s29  ;;  %3618 = vrot.lane.b32.xlu0 %v3617_v10, %s5088_s29 }
 0xde0   :  { %3603 = vrot.lane.b32.xlu1 %v5535_v36, %s5088_s29  ;;  %3605 = vrot.lane.b32.xlu0 %v5538_v13, %s5088_s29 }
 0xde4   :  { %3607 = vrot.lane.b32.xlu1 %v5541_v42, %s5088_s29  ;;  %3609 = vrot.lane.b32.xlu0 %v5544_v48, %s5088_s29 }
 0xe03   :  { %v2908_v17 = vpop.xlane.xlu0 %2907 }
 0xe04   :  { %4924 = vrcp.f32 %v2908_v17 }
 0xe0c   :  { %v2914_v8 = vpop.xlane.xlu1 %2913 }
 0xe0d   :  { %4926 = vrcp.f32 %v2914_v8 }
 0xe11   :  { %v4925_v38 = vpop.eup %4924 }
 0xe12   :  { %v2922_v22 = vmul.f32 %v4925_v38, %v5805_v28 }
 0xe1a   :  { %v4927_v44 = vpop.eup %4926 }
 0xe1b   :  { %v2924_v48 = vmul.f32 %v4927_v44, %v5809_v29 }
 0xe42   :  { %v2928_v12 = vpop.permute.xlu0 %2927 }
 0xe43   :  { %4728 = vmatpush3.msra.mxu0 %v2928_v12 }
 0xe44   :  { %4730 = vmatmul.mubr.msk.f32.vlgmr.msra.gmra.mxu0 %vm74_vm1, %v2922_v22  ;;  %4737 = vmatprep.subr.mxu0 %v5083_v0 }
 0xe45   :  { %4739 = vmatprep.mubr.msk.f32.mxu0 %vm5084_vm0, %v5083_v0 }
 0xe46   :  { %v3082_v36 = vpop.permute.xlu1 %3081  ;;  %v3237_v42 = vpop.permute.xlu0 %3236 }
 0xe47   :  { %4738 = vmatpush3.msra.mxu0 %v3082_v36 }
 0xe48   :  { %4740 = vmatmul.mubr.msk.f32.vlgmr.msra.gmra.mxu0 %vm74_vm1, %v2924_v48  ;;  %4747 = vmatprep.subr.mxu0 %v5083_v0 }
 0xe49   :  { %4748 = vmatpush3.xpose.msk.msra.mxu0 %vm74_vm1, %v3237_v42  ;;  %4749 = vmatprep.mubr.msk.f32.mxu0 %vm5084_vm0, %v5083_v0 }
 0xe4a   :  { %v3235_v28 = vpop.permute.xlu1 %3234  ;;  %v3393_v41 = vpop.permute.xlu0 %3392  ;;  %4757 = vmatprep.subr.mxu0 %v5083_v0 }
 0xe4c   :  { %4750 = vmatmul.mubr.msk.f32.vlgmr.msra.gmra.mxu0 %vm74_vm1, %v3235_v28 }
 0xe4d   :  { %4758 = vmatpush3.xpose.msk.msra.mxu0 %vm74_vm1, %v3393_v41  ;;  %4759 = vmatprep.mubr.msk.f32.mxu0 %vm5084_vm0, %v5083_v0 }
 0xe4e   :  { %v3391_v29 = vpop.permute.xlu1 %3390  ;;  %v5859_v11 = vpop.permute.xlu0 %3618 }
 0xe4f   :  { %4767 = vmatprep.subr.msk.mxu0 %vm74_vm1, %v5859_v11 }
 0xe50   :  { %4760 = vmatmul.mubr.msk.f32.vlgmr.msra.gmra.mxu0 %vm74_vm1, %v3391_v29 }
 0xe51   :  { %4768 = vmatpush3.xpose.msk.msra.mxu0 %vm74_vm1, %v5859_v11 }
 0xe52   :  { %v3604_v30 = vpop.permute.xlu1 %3603  ;;  %v3606_v20 = vpop.permute.xlu0 %3605  ;;  %4783 = vmatprep.subr.mxu0 %v5083_v0 }
 0xe53   :  { %4769 = vmatprep.mubr.msk.f32.mxu0 %vm74_vm1, %v3604_v30  ;;  %v2891_v30 = vsel %vm74_vm1, %v5795_v33, -inf }
 0xe54   :  { %4770 = vmatmul.mubr.msk.f32.vlgmr.msra.gmra.mxu0 %vm74_vm1, %v3606_v20 }
 0xe56   :  { %v3608_v50 = vpop.permute.xlu1 %3607  ;;  %v3610_v24 = vpop.permute.xlu0 %3609 }
 0xe57   :  { %4772 = vmatprep.mubr.msk.f32.mxu0 %vm74_vm1, %v3608_v50 }
 0xe58   :  { %4773 = vmatmul.mubr.msk.f32.gmra.mxu0 %vm74_vm1, %v3610_v24 }
 0xe59   :  { %4785 = vmatprep.mubr.msk.f32.mxu0 %vm5084_vm0, %v5083_v0 }
 0xf04   :  { %v5873_v40 = vpop.f32.mrf.mxu0 }
 0xf06   :  { %v4731_v43 = vpop.f32.mrf.mxu0 }
 0xf07   :  { %v2859_v43 = vmul.f32 %v5538_v13, %v5776_v1 }
 0xf08   :  { %v5875_v46 = vpop.f32.mrf.mxu0 }
 0xf0a   :  { %v4741_v56 = vpop.f32.mrf.mxu0 }
 0xf0c   :  { %v5877_v45 = vpop.f32.mrf.mxu0 }
 0xf0e   :  { %v4751_v53 = vpop.f32.mrf.mxu0 }
 0xf10   :  { %v5879_v55 = vpop.f32.mrf.mxu0 }
 0xf12   :  { %v4761_v5 = vpop.f32.mrf.mxu0 }
 0xf14   :  { %v4771_v31 = vpop.f32.mrf.mxu0 }
 0xf15   :  { %v5883_v14 = vsel %vm71_vm6, -inf, %v4771_v31 }
 0xf16   :  { %v3696_v47 = vpop.f32.mrf.mxu0  ;;  %v3722_v26 = vsel %vm541_vm7, %v5883_v14, -inf }
 0xf17   :  { %v5889_v4 = vsel %vm70_vm5, -inf, %v3696_v47  ;;  %3723 = vmax.xlane.f32.xlu0 %v3722_v26 }
 0xf18   :  { %v3719_v54 = vsel %vm541_vm7, %v5889_v4, -inf  ;;  %v4774_v59 = vpop.f32.mrf.mxu0 }
 0xf19   :  { %3720 = vmax.xlane.f32.xlu1 %v3719_v54  ;;  %v5895_v32 = vsel %vm73_vm8, -inf, %v4774_v59 }
 0xf1a   :  { %v3728_v58 = vsel %vm541_vm7, %v5895_v32, -inf  ;;  %v3706_v34 = vpop.f32.mrf.mxu0 }
 0xf1b   :  { %2886 = vmax.xlane.f32.xlu0 %v2885_v60  ;;  %v5903_v63 = vsel %vm72_vm9, -inf, %v3706_v34 }
 0xf1c   :  { %v3725_v57 = vsel %vm541_vm7, %v5903_v63, -inf }
 0xf1f   :  { %3729 = vmax.xlane.f32.xlu0 %v3728_v58 }
 0xf23   :  { %3726 = vmax.xlane.f32.xlu0 %v3725_v57 }
 0xf2a   :  { %3579 = vrot.lane.b32.xlu1 %v5218_v19, %s5088_s29 }
 0xf39   :  { %3581 = vrot.lane.b32.xlu0 %v5224_v21, %s5088_s29 }
 0xfa0   :  { %v3724_v10 = vpop.xlane.xlu0 %3723 }
 0xfa1   :  { %vm3732_vm2 = vcmp.ge.f32.partialorder %v5883_v14, %v3724_v10  ;;  %v5969_v10 = vld [vmem:[#allocation7 + $0x18] sm:$0xff] }
 0xfa2   :  { %v3736_v17 = vsel %vm3732_vm2, -inf, %v5883_v14  ;;  %v3721_v8 = vpop.xlane.xlu1 %3720 }
 0xfa3   :  { %vm3731_vm3 = vcmp.ge.f32.partialorder %v5889_v4, %v3721_v8  ;;  %v3742_v49 = vsel %vm541_vm7, %v3736_v17, -inf  ;;  %v2861_v17 = vmul.f32 %v5969_v10, %v5784_v15 }
 0xfa4   :  { %v3735_v38 = vsel %vm3731_vm3, -inf, %v5889_v4  ;;  %v2887_v22 = vpop.xlane.xlu0 %2886  ;;  %3743 = vmax.xlane.f32.xlu0 %v3742_v49 }
 0xfa5   :  { %v3739_v12 = vsel %vm541_vm7, %v3735_v38, -inf  ;;  %v2895_v5 = vsub.f32 %v5793_v6, %v2887_v22 }
 0xfa6   :  { %3740 = vmax.xlane.f32.xlu1 %v3739_v12  ;;  %v3580_v28 = vpop.permute.xlu1 %3579 }
 0xfa7   :  { %v3591_v41 = vsel %vm74_vm1, %v3580_v28, 0.0  ;;  %v2900_v26 = vmul.f32 1.442695, %v2895_v5 }
 0xfa8   :  { %v3730_v19 = vpop.xlane.xlu0 %3729 }
 0xfa9   :  { %vm3734_vm4 = vcmp.ge.f32.partialorder %v5895_v32, %v3730_v19  ;;  %4928 = vpow2.f32 %v2900_v26 }
 0xfaa   :  { %v3738_v21 = vsel %vm3734_vm4, -inf, %v5895_v32 }
 0xfab   :  { %v3748_v44 = vsel %vm541_vm7, %v3738_v21, -inf }
 0xfac   :  { %3749 = vmax.xlane.f32.xlu0 %v3748_v44  ;;  %v3727_v36 = vpop.xlane.xlu0 %3726 }
 0xfad   :  { %vm3733_vm5 = vcmp.ge.f32.partialorder %v5903_v63, %v3727_v36 }
 0xfae   :  { %v3737_v42 = vsel %vm3733_vm5, -inf, %v5903_v63 }
 0xfaf   :  { %v3745_v48 = vsel %vm541_vm7, %v3737_v42, -inf }
 0xfb0   :  { %3746 = vmax.xlane.f32.xlu1 %v3745_v48  ;;  %v3582_v29 = vpop.permute.xlu0 %3581 }
 0xfb1   :  { %v3594_v20 = vsel %vm74_vm1, %v3582_v29, 0.0 }
 0xfb6   :  { %v4929_v59 = vpop.eup %4928 }
 0xfb7   :  { %v2909_v60 = vsel %vm74_vm1, %v4929_v59, 0.0 }
 0xfc1   :  { %3583 = vrot.lane.b32.xlu1 %v5230_v23, %s5088_s29 }
 0xfc2   :  { %3585 = vrot.lane.b32.xlu0 %v5236_v25, %s5088_s29 }
 0xfc6   :  { %2868 = vrot.lane.b32.xlu0 %v5797_v52, %s5087_s28 }
 0xfe5   :  { %2892 = vmax.xlane.f32.xlu1 %v2891_v30  ;;  %3592 = vadd.xlane.f32.xlu0 %v3591_v41 }
 0xfe9   :  { %3595 = vadd.xlane.f32.xlu1 %v3594_v20 }
 0xffb   :  { %2872 = vrot.lane.b32.xlu0 %v5800_v27, %s5087_s28 }
0x102d   :  { %v3744_v23 = vpop.xlane.xlu0 %3743 }
0x102e   :  { %vm3752_vm6 = vcmp.ge.f32.partialorder %v5883_v14, %v3744_v23 }
0x102f   :  { %v3741_v25 = vpop.xlane.xlu1 %3740  ;;  %v3756_v54 = vsel %vm3752_vm6, %v5883_v14, -inf }
0x1030   :  { %vm3751_vm8 = vcmp.ge.f32.partialorder %v5889_v4, %v3741_v25  ;;  %v3762_v13 = vsel %vm541_vm7, %v3756_v54, -inf }
0x1031   :  { %v3755_v1 = vsel %vm3751_vm8, %v5889_v4, -inf }
0x1032   :  { %v3759_v6 = vsel %vm541_vm7, %v3755_v1, -inf }
0x1035   :  { %v3750_v50 = vpop.xlane.xlu0 %3749 }
0x1036   :  { %vm3754_vm11 = vcmp.ge.f32.partialorder %v5895_v32, %v3750_v50 }
0x1037   :  { %v3758_v4 = vsel %vm3754_vm11, %v5895_v32, -inf }
0x1039   :  { %v3586_v24 = vpop.permute.xlu0 %3585  ;;  %v3747_v52 = vpop.xlane.xlu1 %3746 }
0x103a   :  { %v3600_v27 = vsel %vm74_vm1, %v3586_v24, 0.0  ;;  %vm3753_vm9 = vcmp.ge.f32.partialorder %v5903_v63, %v3747_v52 }
0x103b   :  { %v3757_v14 = vsel %vm3753_vm9, %v5903_v63, -inf }
0x103d   :  { %v2869_v56 = vpop.permute.xlu0 %2868  ;;  %v3584_v53 = vpop.permute.xlu1 %3583 }
0x103e   :  { %v2879_v31 = vadd.f32 %v2869_v56, %v2859_v43  ;;  %v3597_v47 = vsel %vm74_vm1, %v3584_v53, 0.0 }
0x103f   :  { %3598 = vadd.xlane.f32.xlu1 %v3597_v47 }
0x1040   :  { %3004 = vrot.lane.b32.xlu0 %v2879_v31, %s5086_s2 }
0x1043   :  { %3601 = vadd.xlane.f32.xlu1 %v3600_v27 }
0x1044   :  { %3314 = vrot.lane.b32.xlu0 %v5698_v62, %s5088_s29  ;;  %v3765_v62 = vsel %vm541_vm7, %v3757_v14, -inf }
0x1047   :  { %3763 = vmax.xlane.f32.xlu1 %v3762_v13 }
0x1048   :  { %3312 = vrot.lane.b32.xlu0 %v5704_v16, %s5088_s29  ;;  %v3768_v16 = vsel %vm541_vm7, %v3758_v4, -inf }
0x104b   :  { %3760 = vmax.xlane.f32.xlu1 %v3759_v6 }
0x104c   :  { %3470 = vrot.lane.b32.xlu0 %v5735_v3, %s5088_s29 }
0x104f   :  { %3766 = vmax.xlane.f32.xlu1 %v3765_v62 }
0x1050   :  { %3468 = vrot.lane.b32.xlu0 %v5731_v51, %s5088_s29 }
0x1053   :  { %3769 = vmax.xlane.f32.xlu1 %v3768_v16 }
0x1057   :  { %2910 = vadd.xlane.f32.xlu1 %v2909_v60 }
0x106e   :  { %v2893_v58 = vpop.xlane.xlu1 %2892  ;;  %v5967_v57 = vpop.xlane.xlu0 %3592 }
0x106f   :  { %v2897_v34 = vsub.f32 %v5795_v33, %v2893_v58 }
0x1071   :  { %v2904_v63 = vmul.f32 1.442695, %v2897_v34 }
0x1072   :  { %v2873_v51 = vpop.permute.xlu0 %2872  ;;  %v5975_v49 = vpop.xlane.xlu1 %3595 }
0x1073   :  { %4930 = vpow2.f32 %v2904_v63  ;;  %v2881_v8 = vadd.f32 %v2873_v51, %v2861_v17 }
0x1080   :  { %v5963_v3 = vpop.eup %4930 }
0x1081   :  { %v2915_v32 = vsel %vm74_vm1, %v5963_v3, 0.0 }
0x1082   :  { %2916 = vadd.xlane.f32.xlu1 %v2915_v32 }
0x1093   :  { %3158 = vrot.lane.b32.xlu1 %v2881_v8, %s5086_s2 }
0x10b2   :  { %v3005_v33 = vpop.permute.xlu0 %3004 }
0x10b3   :  { %4733 = vmatpush3.msra.mxu1 %v3005_v33 }
0x10b4   :  { %4742 = vmatprep.subr.mxu1 %v5083_v0 }
0x10c8   :  { %v5977_v38 = vpop.xlane.xlu1 %3598 }
0x10cc   :  { %v5979_v22 = vpop.xlane.xlu1 %3601 }
0x10d0   :  { %v3764_v12 = vpop.xlane.xlu1 %3763 }
0x10d1   :  { %v5982_v19 = vmax.f32 %v5975_v49, %v3764_v12 }
0x10d3   :  { %v3776_v15 = vsub.f32 %v5975_v49, %v5982_v19  ;;  %v3788_v21 = vsub.f32 %v3756_v54, %v5982_v19  ;;  %v3950_v54 = vsel %vm74_vm1, %v5877_v45, -inf }
0x10d4   :  { %v3761_v44 = vpop.xlane.xlu1 %3760 }
0x10d5   :  { %v3793_v36 = vmul.f32 1.442695, %v3788_v21  ;;  %v5988_v42 = vmax.f32 %v5967_v57, %v3761_v44 }
0x10d7   :  { %v3787_v48 = vsub.f32 %v3755_v1, %v5988_v42  ;;  %4932 = vpow2.f32 %v3793_v36  ;;  %v3775_v51 = vsub.f32 %v5967_v57, %v5988_v42 }
0x10d8   :  { %v3767_v28 = vpop.xlane.xlu1 %3766 }
0x10d9   :  { %v3791_v41 = vmul.f32 1.442695, %v3787_v48  ;;  %v3773_v29 = vmax.f32 %v5977_v38, %v3767_v28  ;;  %v3779_v17 = vmul.f32 1.442695, %v3775_v51 }
0x10db   :  { %v3777_v30 = vsub.f32 %v5977_v38, %v3773_v29  ;;  %v3789_v20 = vsub.f32 %v3757_v14, %v3773_v29  ;;  %4934 = vpow2.f32 %v3791_v41  ;;  %v3956_v14 = vsel %vm74_vm1, %v5879_v55, -inf }
0x10dc   :  { %v3770_v23 = vpop.xlane.xlu1 %3769 }
0x10dd   :  { %v3795_v25 = vmul.f32 1.442695, %v3789_v20  ;;  %v3774_v50 = vmax.f32 %v5979_v22, %v3770_v23  ;;  %v3783_v8 = vmul.f32 1.442695, %v3777_v30 }
0x10df   :  { %v3778_v24 = vsub.f32 %v5979_v22, %v3774_v50  ;;  %v3790_v52 = vsub.f32 %v3758_v4, %v3774_v50  ;;  %4936 = vpow2.f32 %v3795_v25 }
0x10e0   :  { %v2911_v43 = vpop.xlane.xlu1 %2910 }
0x10e1   :  { %v3797_v56 = vmul.f32 1.442695, %v3790_v52  ;;  %4938 = vrcp.f32 %v2911_v43  ;;  %v3785_v33 = vmul.f32 1.442695, %v3778_v24 }
0x10e3   :  { %4940 = vpow2.f32 %v3797_v56 }
0x10e4   :  { %v5995_v53 = vpop.eup %4932 }
0x10e5   :  { %v3802_v5 = vsel %vm541_vm7, %v5995_v53, 0.0 }
0x10e6   :  { %3803 = vadd.xlane.f32.xlu0 %v3802_v5 }
0x10e8   :  { %v5999_v31 = vpop.eup %4934 }
0x10e9   :  { %v3799_v47 = vsel %vm541_vm7, %v5999_v31, 0.0 }
0x10ea   :  { %3800 = vadd.xlane.f32.xlu1 %v3799_v47 }
0x10ec   :  { %v6003_v27 = vpop.eup %4936 }
0x10ed   :  { %v3805_v13 = vsel %vm541_vm7, %v6003_v27, 0.0 }
0x10ee   :  { %v4939_v26 = vpop.eup %4938  ;;  %3951 = vmax.xlane.f32.xlu1 %v3950_v54  ;;  %3806 = vadd.xlane.f32.xlu0 %v3805_v13 }
0x10ef   :  { %v2923_v1 = vmul.f32 %v4939_v26, %v4929_v59  ;;  %v3315_v59 = vpop.permute.xlu0 %3314 }
0x10f0   :  { %v6009_v6 = vpop.eup %4940 }
0x10f1   :  { %4735 = vmatmul.mubr.msk.f32.vlgmr.msra.gmra.mxu1 %vm74_vm1, %v2923_v1  ;;  %v3808_v62 = vsel %vm541_vm7, %v6009_v6, 0.0 }
0x10f2   :  { %4744 = vmatprep.mubr.msk.f32.mxu1 %vm5084_vm0, %v5083_v0  ;;  %3957 = vmax.xlane.f32.xlu1 %v3956_v14 }
0x10f3   :  { %3809 = vadd.xlane.f32.xlu0 %v3808_v62  ;;  %v3313_v60 = vpop.permute.xlu0 %3312 }
0x10f7   :  { %v3471_v63 = vpop.permute.xlu0 %3470 }
0x10fb   :  { %v3469_v32 = vpop.permute.xlu0 %3468 }
0x110b   :  { %v2917_v4 = vpop.xlane.xlu1 %2916 }
0x110c   :  { %4942 = vrcp.f32 %v2917_v4 }
0x110f   :  { %v3159_v16 = vpop.permute.xlu1 %3158 }
0x1110   :  { %4743 = vmatpush3.msra.mxu1 %v3159_v16 }
0x1111   :  { %4752 = vmatprep.subr.mxu1 %v5083_v0 }
0x1119   :  { %v4943_v58 = vpop.eup %4942 }
0x111a   :  { %v2925_v34 = vmul.f32 %v4943_v58, %v5963_v3  ;;  %v3781_v3 = vmul.f32 1.442695, %v3776_v15 }
0x111c   :  { %4745 = vmatmul.mubr.msk.f32.vlgmr.msra.gmra.mxu1 %vm74_vm1, %v2925_v34  ;;  %4944 = vpow2.f32 %v3781_v3 }
0x111d   :  { %4753 = vmatpush3.xpose.msk.msra.mxu1 %vm74_vm1, %v3315_v59  ;;  %4754 = vmatprep.mubr.msk.f32.mxu1 %vm5084_vm0, %v5083_v0  ;;  %4946 = vpow2.f32 %v3779_v17 }
0x111e   :  { %4762 = vmatprep.subr.mxu1 %v5083_v0  ;;  %4948 = vpow2.f32 %v3783_v8 }
0x111f   :  { %4950 = vpow2.f32 %v3785_v33 }
0x1120   :  { %4755 = vmatmul.mubr.msk.f32.vlgmr.msra.gmra.mxu1 %vm74_vm1, %v3313_v60 }
0x1121   :  { %4763 = vmatpush3.xpose.msk.msra.mxu1 %vm74_vm1, %v3471_v63  ;;  %4764 = vmatprep.mubr.msk.f32.mxu1 %vm5084_vm0, %v5083_v0 }
0x1122   :  { %4775 = vmatprep.subr.msk.mxu1 %vm658_vm12, %v5859_v11 }
0x1124   :  { %4765 = vmatmul.mubr.msk.f32.vlgmr.msra.gmra.mxu1 %vm74_vm1, %v3469_v32 }
0x1125   :  { %4776 = vmatpush3.msk.msra.mxu1 %vm658_vm12, %v5859_v11  ;;  %vm4364_vm12 = vcmask 261120  }
0x1126   :  { %4788 = vmatprep.subr.mxu1 %v5083_v0 }
0x1129   :  { %v4945_v38 = vpop.eup %4944 }
0x112a   :  { %v4947_v11 = vpop.eup %4946 }
0x112b   :  { %v4949_v49 = vpop.eup %4948 }
0x112c   :  { %v4951_v57 = vpop.eup %4950 }
0x116f   :  { %v3804_v22 = vpop.xlane.xlu0 %3803 }
0x1170   :  { %v3812_v12 = vadd.f32 %v4945_v38, %v3804_v22 }
0x1172   :  { %4952 = vrcp.f32 %v3812_v12 }
0x1173   :  { %v3801_v21 = vpop.xlane.xlu1 %3800 }
0x1174   :  { %v3811_v44 = vadd.f32 %v4947_v11, %v3801_v21 }
0x1176   :  { %4954 = vrcp.f32 %v3811_v44 }
0x1177   :  { %v3807_v19 = vpop.xlane.xlu0 %3806  ;;  %v3952_v16 = vpop.xlane.xlu1 %3951 }
0x1178   :  { %v3813_v15 = vadd.f32 %v4949_v49, %v3807_v19  ;;  %v3962_v59 = vsub.f32 %v5877_v45, %v3952_v16 }
0x117a   :  { %4956 = vrcp.f32 %v3813_v15  ;;  %v3966_v60 = vmul.f32 1.442695, %v3962_v59 }
0x117b   :  { %v3958_v58 = vpop.xlane.xlu1 %3957 }
0x117c   :  { %v3810_v36 = vpop.xlane.xlu0 %3809  ;;  %v3964_v34 = vsub.f32 %v5879_v55, %v3958_v58 }
0x117d   :  { %v3814_v42 = vadd.f32 %v4951_v57, %v3810_v36  ;;  %v4990_v36 = vld [vmem:[#allocation7] sm:$0xff] }
0x117e   :  { %v3970_v3 = vmul.f32 1.442695, %v3964_v34 }
0x117f   :  { %4958 = vrcp.f32 %v3814_v42  ;;  %v4953_v48 = vpop.eup %4952 }
0x1180   :  { %v6040_v28 = vmul.f32 %v4953_v48, %v4945_v38  ;;  %v3820_v20 = vmul.f32 %v4953_v48, %v5995_v53  ;;  %4960 = vpow2.f32 %v3966_v60 }
0x1183   :  { %v4955_v41 = vpop.eup %4954 }
0x1184   :  { %v3819_v29 = vmul.f32 %v4955_v41, %v5999_v31  ;;  %v6043_v30 = vmul.f32 %v4955_v41, %v4947_v11 }
0x1186   :  { %4777 = vmatprep.mubr.msk.f32.mxu1 %vm541_vm7, %v3819_v29  ;;  %v3926_v42 = vmul.f32 %v4990_v36, %v6043_v30 }
0x1187   :  { %v4957_v23 = vpop.eup %4956  ;;  %4778 = vmatmul.mubr.msk.f32.vlgmr.msra.gmra.mxu1 %vm541_vm7, %v3820_v20  ;;  %v4991_v20 = vld [vmem:[#allocation7 + $0x10] sm:$0xff] }
0x1188   :  { %v3821_v25 = vmul.f32 %v4957_v23, %v6003_v27  ;;  %v6049_v50 = vmul.f32 %v4957_v23, %v4949_v49  ;;  %v4989_v49 = vld [vmem:[#allocation7 + $0x8] sm:$0xff] }
0x1189   :  { %v3927_v19 = vmul.f32 %v4989_v49, %v6040_v28 }
0x118a   :  { %4780 = vmatprep.mubr.msk.f32.mxu1 %vm541_vm7, %v3821_v25  ;;  %v3928_v23 = vmul.f32 %v4991_v20, %v6049_v50 }
0x118c   :  { %v4959_v24 = vpop.eup %4958 }
0x118d   :  { %v3822_v52 = vmul.f32 %v4959_v24, %v6009_v6  ;;  %v6053_v43 = vmul.f32 %v4959_v24, %v4951_v57  ;;  %v4961_v38 = vpop.eup %4960 }
0x118e   :  { %v3974_v22 = vsel %vm74_vm1, %v4961_v38, 0.0 }
0x118f   :  { %4781 = vmatmul.mubr.msk.f32.gmra.mxu1 %vm541_vm7, %v3822_v52  ;;  %v3929_v30 = vmul.f32 %v5969_v10, %v6053_v43  ;;  %vm4359_vm7 = vcmask 195584  }
0x1190   :  { %4790 = vmatprep.mubr.msk.f32.mxu1 %vm5084_vm0, %v5083_v0 }
0x11b1   :  { %v6058_v56 = vpop.f32.mrf.mxu1 }
0x11b3   :  { %v4736_v53 = vpop.f32.mrf.mxu1 }
0x11dc   :  { %v6060_v5 = vpop.f32.mrf.mxu1 }
0x11de   :  { %v4746_v31 = vpop.f32.mrf.mxu1 }
0x11e0   :  { %v3386_v47 = vpop.f32.mrf.mxu1 }
0x11e1   :  { %v3953_v27 = vsel %vm74_vm1, %v3386_v47, -inf }
0x11e2   :  { %3954 = vmax.xlane.f32.xlu0 %v3953_v27  ;;  %v4756_v26 = vpop.f32.mrf.mxu1 }
0x11e4   :  { %v3542_v54 = vpop.f32.mrf.mxu1 }
0x11e5   :  { %v3959_v13 = vsel %vm74_vm1, %v3542_v54, -inf }
0x11e6   :  { %3960 = vmax.xlane.f32.xlu0 %v3959_v13  ;;  %v4766_v1 = vpop.f32.mrf.mxu1 }
0x1247   :  { %v4779_v6 = vpop.f32.mrf.mxu1 }
0x1248   :  { %3936 = vrot.lane.b32.xlu0 %v4779_v6, %s5089_s30 }
0x1249   :  { %v3903_v14 = vpop.f32.mrf.mxu1 }
0x124a   :  { %3934 = vrot.lane.b32.xlu1 %v3903_v14, %s5089_s30 }
0x124f   :  { %v4782_v62 = vpop.f32.mrf.mxu1 }
0x1250   :  { %3940 = vrot.lane.b32.xlu1 %v4782_v62, %s5089_s30 }
0x1251   :  { %v3913_v4 = vpop.f32.mrf.mxu1 }
0x1254   :  { %3938 = vrot.lane.b32.xlu1 %v3913_v4, %s5089_s30 }
0x126b   :  { %v3955_v63 = vpop.xlane.xlu0 %3954 }
0x126c   :  { %v3963_v32 = vsub.f32 %v3386_v47, %v3955_v63 }
0x126e   :  { %v3968_v51 = vmul.f32 1.442695, %v3963_v32 }
0x126f   :  { %v3961_v17 = vpop.xlane.xlu0 %3960 }
0x1270   :  { %4962 = vpow2.f32 %v3968_v51  ;;  %v3965_v8 = vsub.f32 %v3542_v54, %v3961_v17 }
0x1271   :  { %4964 = vpow2.f32 %v3970_v3 }
0x1272   :  { %v3972_v33 = vmul.f32 1.442695, %v3965_v8 }
0x1274   :  { %4966 = vpow2.f32 %v3972_v33 }
0x1278   :  { %3975 = vadd.xlane.f32.xlu1 %v3974_v22 }
0x127d   :  { %v4963_v45 = vpop.eup %4962 }
0x127e   :  { %v3977_v12 = vsel %vm74_vm1, %v4963_v45, 0.0  ;;  %v4965_v11 = vpop.eup %4964 }
0x127f   :  { %3978 = vadd.xlane.f32.xlu0 %v3977_v12  ;;  %v3980_v55 = vsel %vm74_vm1, %v4965_v11, 0.0 }
0x1281   :  { %v4967_v21 = vpop.eup %4966 }
0x1282   :  { %v3983_v44 = vsel %vm74_vm1, %v4967_v21, 0.0 }
0x1283   :  { %3981 = vadd.xlane.f32.xlu0 %v3980_v55 }
0x1287   :  { %3984 = vadd.xlane.f32.xlu0 %v3983_v44 }
0x12ba   :  { %v3937_v15 = vpop.permute.xlu0 %3936 }
0x12bb   :  { %v3947_v57 = vadd.f32 %v3937_v15, %v3927_v19 }
0x12bc   :  { %v3935_v48 = vpop.permute.xlu1 %3934 }
0x12bd   :  { %v3946_v41 = vadd.f32 %v3935_v48, %v3926_v42  ;;  %4072 = vrot.lane.b32.xlu0 %v3947_v57, %s5088_s29 }
0x12bf   :  { %3995 = vrot.lane.b32.xlu1 %v3946_v41, %s5088_s29 }
0x12c1   :  { %4308 = vrot.lane.b32.xlu0 %v5789_v39, %s5081_s18 }
0x12c2   :  { %v3941_v29 = vpop.permute.xlu1 %3940 }
0x12c3   :  { %v3949_v24 = vadd.f32 %v3941_v29, %v3929_v30 }
0x12c5   :  { %4312 = vrot.lane.b32.xlu0 %v5791_v2, %s5081_s18 }
0x12c6   :  { %v3939_v28 = vpop.permute.xlu1 %3938 }
0x12c7   :  { %v3948_v25 = vadd.f32 %v3939_v28, %v3928_v23 }
0x12c9   :  { %4149 = vrot.lane.b32.xlu1 %v3948_v25, %s5088_s29  ;;  %4324 = vrot.lane.b32.xlu0 %v6058_v56, %s5087_s28 }
0x12cd   :  { %4226 = vrot.lane.b32.xlu1 %v3949_v24, %s5088_s29  ;;  %4328 = vrot.lane.b32.xlu0 %v6060_v5, %s5087_s28 }
0x12d1   :  { %4306 = vrot.lane.b32.xlu1 %v5611_v61, %s5081_s18 }
0x12d5   :  { %4310 = vrot.lane.b32.xlu1 %v5613_v18, %s5081_s18 }
0x12d9   :  { %4322 = vrot.lane.b32.xlu1 %v5873_v40, %s5087_s28 }
0x12dd   :  { %4326 = vrot.lane.b32.xlu1 %v5875_v46, %s5087_s28 }
0x1301   :  { %v3976_v2 = vpop.xlane.xlu1 %3975 }
0x1308   :  { %v3979_v39 = vpop.xlane.xlu0 %3978 }
0x1309   :  { %4968 = vrcp.f32 %v3979_v39 }
0x130a   :  { %4970 = vrcp.f32 %v3976_v2 }
0x130c   :  { %v3982_v10 = vpop.xlane.xlu0 %3981 }
0x130d   :  { %4972 = vrcp.f32 %v3982_v10 }
0x1310   :  { %v3985_v50 = vpop.xlane.xlu0 %3984 }
0x1311   :  { %4974 = vrcp.f32 %v3985_v50 }
0x1316   :  { %v4969_v52 = vpop.eup %4968 }
0x1317   :  { %v4971_v43 = vpop.eup %4970  ;;  %v3991_v61 = vmul.f32 %v4969_v52, %v4963_v45 }
0x1318   :  { %v3990_v18 = vmul.f32 %v4971_v43, %v4961_v38 }
0x131a   :  { %v4973_v46 = vpop.eup %4972 }
0x131b   :  { %v3992_v5 = vmul.f32 %v4973_v46, %v4965_v11 }
0x131e   :  { %v4975_v31 = vpop.eup %4974 }
0x131f   :  { %v3993_v27 = vmul.f32 %v4975_v31, %v4967_v21 }
0x132f   :  { %v4073_v56 = vpop.permute.xlu0 %4072 }
0x1330   :  { %4789 = vmatpush3.msra.mxu1 %v4073_v56 }
0x1331   :  { %4791 = vmatmul.mubr.msk.f32.vlgmr.msra.gmra.mxu1 %vm74_vm1, %v3991_v61  ;;  %v3996_v40 = vpop.permute.xlu1 %3995  ;;  %4798 = vmatprep.subr.mxu1 %v5083_v0 }
0x1332   :  { %4784 = vmatpush3.msra.mxu0 %v3996_v40  ;;  %4800 = vmatprep.mubr.msk.f32.mxu1 %vm5084_vm0, %v5083_v0 }
0x1333   :  { %4786 = vmatmul.mubr.msk.f32.vlgmr.msra.gmra.mxu0 %vm74_vm1, %v3990_v18  ;;  %4793 = vmatprep.subr.mxu0 %v5083_v0  ;;  %v4309_v4 = vpop.permute.xlu0 %4308 }
0x1334   :  { %4795 = vmatprep.mubr.msk.f32.mxu0 %vm5084_vm0, %v5083_v0  ;;  %vm4354_vm0 = vcmask 130048   ;;  %v4351_v3 = vsel %vm74_vm1, %v5511_v7, %v4309_v4 }
0x1337   :  { %v4313_v59 = vpop.permute.xlu0 %4312 }
0x133b   :  { %v4150_v53 = vpop.permute.xlu1 %4149  ;;  %v4325_v58 = vpop.permute.xlu0 %4324 }
0x133c   :  { %4794 = vmatpush3.msra.mxu0 %v4150_v53  ;;  %v4356_v51 = vsel %vm4354_vm0, %v4351_v3, %v4325_v58 }
0x133d   :  { %4796 = vmatmul.mubr.msk.f32.vlgmr.msra.gmra.mxu0 %vm74_vm1, %v3992_v5 }
0x133f   :  { %v4227_v47 = vpop.permute.xlu1 %4226  ;;  %v4329_v63 = vpop.permute.xlu0 %4328 }
0x1340   :  { %4799 = vmatpush3.msra.mxu1 %v4227_v47 }
0x1341   :  { %4801 = vmatmul.mubr.msk.f32.vlgmr.msra.gmra.mxu1 %vm74_vm1, %v3993_v27 }
0x1343   :  { %v4307_v16 = vpop.permute.xlu1 %4306 }
0x1344   :  { %v4350_v8 = vsel %vm74_vm1, %v5385_v35, %v4307_v16  ;;  %v4353_v35 = vsel %vm74_vm1, %v5513_v9, %v4313_v59 }
0x1345   :  { %v4358_v21 = vsel %vm4354_vm0, %v4353_v35, %v4329_v63 }
0x1347   :  { %v4311_v60 = vpop.permute.xlu1 %4310 }
0x1348   :  { %v4352_v7 = vsel %vm74_vm1, %v5387_v37, %v4311_v60 }
0x134b   :  { %v4323_v34 = vpop.permute.xlu1 %4322 }
0x134c   :  { %v4355_v38 = vsel %vm4354_vm0, %v4350_v8, %v4323_v34 }
0x134f   :  { %v4327_v32 = vpop.permute.xlu1 %4326 }
0x1350   :  { %v4357_v12 = vsel %vm4354_vm0, %v4352_v7, %v4327_v32 }
0x13f1   :  { %v4144_v26 = vpop.f32.mrf.mxu1 }
0x13f2   :  { %4340 = vrot.lane.b32.xlu0 %v4144_v26, %s5089_s30 }
0x13f3   :  { %v4067_v54 = vpop.f32.mrf.mxu0  ;;  %v4792_v13 = vpop.f32.mrf.mxu1 }
0x13f4   :  { %4338 = vrot.lane.b32.xlu1 %v4067_v54, %s5089_s30 }
0x13f5   :  { %v4787_v0 = vpop.f32.mrf.mxu0 }
0x13fd   :  { %v4221_v1 = vpop.f32.mrf.mxu0 }
0x13fe   :  { %4342 = vrot.lane.b32.xlu1 %v4221_v1, %s5089_s30 }
0x13ff   :  { %v4797_v6 = vpop.f32.mrf.mxu0 }
0x1401   :  { %v4298_v14 = vpop.f32.mrf.mxu1 }
0x1402   :  { %4344 = vrot.lane.b32.xlu0 %v4298_v14, %s5089_s30 }
0x1403   :  { %v4802_v62 = vpop.f32.mrf.mxu1 }
0x1464   :  { %v4341_v17 = vpop.permute.xlu0 %4340 }
0x1465   :  { %v4361_v33 = vsel %vm4359_vm7, %v4356_v51, %v4341_v17 }
0x1466   :  { %4366 = vst.msk [vmem:[#allocation8 + $0x8] sm:$0xff] %vm4364_vm12, %v4361_v33  ;;  %v4339_v22 = vpop.permute.xlu1 %4338 }
0x1467   :  { %v4360_v45 = vsel %vm4359_vm7, %v4355_v38, %v4339_v22 }
0x1468   :  { %4365 = vst.msk [vmem:[#allocation8] sm:$0xff] %vm4364_vm12, %v4360_v45 }
0x1470   :  { %v4343_v11 = vpop.permute.xlu1 %4342 }
0x1471   :  { %v4362_v55 = vsel %vm4359_vm7, %v4357_v12, %v4343_v11 }
0x1472   :  { %4367 = vst.msk [vmem:[#allocation8 + $0x10] sm:$0xff] %vm4364_vm12, %v4362_v55 }
0x1474   :  { %v4345_v44 = vpop.permute.xlu0 %4344 }
0x1475   :  { %v4363_v49 = vsel %vm4359_vm7, %v4358_v21, %v4345_v44 }
0x1476   :  { %4368 = vst.msk [vmem:[#allocation8 + $0x18] sm:$0xff] %vm4364_vm12, %v4363_v49 }
0x1477   :  { %5063 = shalt.err (!%p5060_p5)
}
0x1478   :  { %4380 = dma.vmem_to_hbm [thread:$0]  %s4375_s5, 512, %s6142_s3, [#allocation4], %s5080_s17, %s5080_s17, %s5081_s18  }
0x1479   :  { %5076 = dma.done.wait [#allocation4], 512  }
0x147a   :  { %5077 = vsyncadd [#allocation4], 4294966784 }
0x147b   :  { %4384 = vsyncpa [#allocation3], 1 }
0x147c   :  { %4385 = vsyncpa [#allocation6], 1 }
0x147d   :  { %4386 = vsyncpa [#allocation4], 1 }

</bundles_post_ra>
